<compile_context>
chip_gen: v6e
topology: v6e:2x2x1
jax: 0.10.0
libtpu: 0.0.40
codegen_flags: <defaults>
</compile_context>

<pallas_src>
import functools

import jax
import jax.numpy as jnp
from jax.experimental import pallas as pl
from jax.experimental.pallas import tpu as pltpu

_NEG_BIG = -1.0e10


def _round_up(x, m):
    return ((x + m - 1) // m) * m


def actor_critic_kernel(state_ref, mask_ref, w1_ref, b1_ref, wh_ref, bh_ref,
                        out_ref, *, critic_lane):
    # l1: (TB, 4E) f32 -> bf16 in-kernel, MXU dot with f32 accumulation.
    x = jnp.dot(state_ref[...].astype(jnp.bfloat16), w1_ref[...],
                preferred_element_type=jnp.float32) + b1_ref[...]

    # fused actor|critic head: (TB, HID_PAD) @ (HID_PAD, FUSED_N)
    fused = jnp.dot(x.astype(jnp.bfloat16), wh_ref[...],
                    preferred_element_type=jnp.float32) + bh_ref[...]

    # mask: 1 = valid action lane, 0 = invalid / padded lane / critic lane.
    valid = mask_ref[...] != 0
    logits = jnp.where(valid, fused, _NEG_BIG)

    # numerically stable softmax over the (padded) action lanes
    m = jnp.max(logits, axis=-1, keepdims=True)
    e = jnp.exp(logits - m)
    denom = jnp.sum(e, axis=-1, keepdims=True)
    probs = e * pl.reciprocal(denom, approx=True)

    # single lane-dense store: probs everywhere, raw critic value in its lane
    lane = jax.lax.broadcasted_iota(jnp.int32, out_ref.shape, 1)
    out_ref[...] = jnp.where(lane == critic_lane, fused, probs)


def pack_params(params, act_dim):
    """Pack (pre-transposed) Linear params into the fused bf16 kernel layout."""
    w1, b1 = params["w1"], params["b1"]            # (4E, 2E), (1, 2E)
    wa, ba = params["wa"], params["ba"]            # (2E, A),  (1, A)
    wc, bc = params["wc"], params["bc"]            # (2E, 1),  (1, 1)
    four_e, two_e = w1.shape

    hid_pad = _round_up(two_e, 128)                # full-lane hidden tile
    act_pad = _round_up(act_dim, 128)
    if act_dim < act_pad:
        fused_n, critic_lane = act_pad, act_dim    # critic parked in a free lane
    else:
        fused_n, critic_lane = act_pad + 128, act_pad

    w1p = jnp.zeros((four_e, hid_pad), jnp.float32).at[:, :two_e].set(w1)
    b1p = jnp.zeros((1, hid_pad), jnp.float32).at[:, :two_e].set(b1.reshape(1, -1))

    wh = jnp.zeros((hid_pad, fused_n), jnp.float32)
    wh = wh.at[:two_e, :act_dim].set(wa)
    wh = wh.at[:two_e, critic_lane:critic_lane + 1].set(wc)
    bh = jnp.zeros((1, fused_n), jnp.float32)
    bh = bh.at[:, :act_dim].set(ba.reshape(1, -1))
    bh = bh.at[:, critic_lane:critic_lane + 1].set(bc.reshape(1, 1))

    return {
        "w1": w1p.astype(jnp.bfloat16),
        "b1": b1p.astype(jnp.float32),
        "wh": wh.astype(jnp.bfloat16),
        "bh": bh.astype(jnp.float32),
        "act_dim": act_dim,
        "act_pad": act_pad,
        "fused_n": fused_n,
        "critic_lane": critic_lane,
        "hid_pad": hid_pad,
    }


def actor_critic_forward(state, act_mask, packed, *, batch_tile=512):
    """state: (B, 1, 4E) f32; act_mask: (B, act_dim) bool.

    Returns (act_probs (B, act_dim) f32, state_values (B, 1) f32).
    """
    B = state.shape[0]
    in_dim = state.shape[-1]
    act_dim = packed["act_dim"]
    fused_n = packed["fused_n"]
    critic_lane = packed["critic_lane"]
    hid_pad = packed["hid_pad"]
    w1, b1, wh, bh = packed["w1"], packed["b1"], packed["wh"], packed["bh"]

    # Tile choice: at least 2 tiles when B allows (v7x megacore gets work on
    # both TCs), at most `batch_tile` rows per tile (1-2 steps on v5e/v6e).
    if B >= 16:
        tb = min(batch_tile, _round_up(pl.cdiv(B, 2), 8))
    else:
        tb = _round_up(B, 8)
    b_pad = _round_up(B, tb)

    # State stays f32; the bf16 cast happens in-kernel (no wrapper pass).
    state2d = state.reshape(B, in_dim)
    if b_pad != B:
        state2d = jnp.pad(state2d, ((0, b_pad - B), (0, 0)))

    # int8 mask: 1 = valid action, 0 = invalid / padded lane / critic lane.
    # Padded batch rows (if any) end up all-zero -> finite garbage, sliced off.
    mask_p = jnp.zeros((b_pad, fused_n), jnp.int8)
    mask_p = mask_p.at[:B, :act_dim].set(act_mask.astype(jnp.int8))

    grid = (b_pad // tb,)

    # VMEM budget: resident weights + double-buffered batch tiles; clamp to a
    # fraction of this generation's VMEM capacity (v7x has only 64 MiB/TC).
    weight_bytes = w1.size * 2 + b1.size * 4 + wh.size * 2 + bh.size * 4
    tile_bytes = tb * in_dim * 4 + tb * fused_n * 1 + tb * fused_n * 4
    try:
        vmem_cap = int(pltpu.get_tpu_info().vmem_capacity_bytes)
    except Exception:  # pragma: no cover - conservative fallback
        vmem_cap = 64 << 20
    vmem_limit = int(min(max(2 * (weight_bytes + 2 * tile_bytes), 8 << 20),
                         (3 * vmem_cap) // 4))

    kernel = functools.partial(actor_critic_kernel, critic_lane=critic_lane)

    out = pl.pallas_call(
        kernel,
        out_shape=jax.ShapeDtypeStruct((b_pad, fused_n), jnp.float32),
        grid=grid,
        in_specs=[
            pl.BlockSpec((tb, in_dim), lambda i: (i, 0)),       # state tile (f32)
            pl.BlockSpec((tb, fused_n), lambda i: (i, 0)),      # mask tile (int8)
            pl.BlockSpec((in_dim, hid_pad), lambda i: (0, 0)),  # w1 (resident)
            pl.BlockSpec((1, hid_pad), lambda i: (0, 0)),       # b1 (resident)
            pl.BlockSpec((hid_pad, fused_n), lambda i: (0, 0)), # wh (resident)
            pl.BlockSpec((1, fused_n), lambda i: (0, 0)),       # bh (resident)
        ],
        out_specs=pl.BlockSpec((tb, fused_n), lambda i: (i, 0)),
        compiler_params=pltpu.CompilerParams(
            dimension_semantics=("parallel",),
            vmem_limit_bytes=vmem_limit,
        ),
    )(state2d, mask_p, w1, b1, wh, bh)

    probs = out[:B, :act_dim]
    values = out[:B, critic_lane:critic_lane + 1]
    return probs, values


def init_params(key, embed_size, act_dim):
    """Deterministic synthetic parameters (PyTorch Linear shapes, pre-transposed)."""
    k1, k2, k3 = jax.random.split(key, 3)
    four_e, two_e = 4 * embed_size, 2 * embed_size
    scale = 0.02
    return {
        "w1": scale * jax.random.normal(k1, (four_e, two_e), jnp.float32),
        "b1": jnp.zeros((1, two_e), jnp.float32),
        "wa": scale * jax.random.normal(k2, (two_e, act_dim), jnp.float32),
        "ba": jnp.zeros((1, act_dim), jnp.float32),
        "wc": scale * jax.random.normal(k3, (two_e, 1), jnp.float32),
        "bc": jnp.zeros((1, 1), jnp.float32),
    }


if __name__ == "__main__":
    B = 512          # batched workload -> grid = (2,), both v7x TCs busy
    EMBED = 32       # state dim = 4*32 = 128, hidden = 2*32 = 64 (padded to 128)
    ACT_DIM = 250    # deliberately NOT a multiple of 128 (exercises lane padding)

    key = jax.random.PRNGKey(0)
    k_state, k_mask, k_param = jax.random.split(key, 3)

    state = jax.random.normal(k_state, (B, 1, 4 * EMBED), jnp.float32)
    act_mask = jax.random.bernoulli(k_mask, p=0.7, shape=(B, ACT_DIM))
    act_mask = act_mask.at[:, 0].set(True)   # at least one valid action per row

    params = init_params(k_param, EMBED, ACT_DIM)
    packed = pack_params(params, ACT_DIM)

    fwd = jax.jit(functools.partial(actor_critic_forward, packed=packed))
    probs, values = fwd(state, act_mask)
    jax.block_until_ready((probs, values))

    # pure-JAX reference using the same bf16-operand / f32-accumulate numerics
    st = state.reshape(B, -1).astype(jnp.bfloat16)
    x_ref = jnp.dot(st, params["w1"].astype(jnp.bfloat16),
                    preferred_element_type=jnp.float32) + params["b1"]
    xh = x_ref.astype(jnp.bfloat16)
    logits_ref = jnp.dot(xh, params["wa"].astype(jnp.bfloat16),
                         preferred_element_type=jnp.float32) + params["ba"]
    masked_ref = jnp.where(act_mask, logits_ref, _NEG_BIG)
    probs_ref = jax.nn.softmax(masked_ref, axis=-1)
    values_ref = jnp.dot(xh, params["wc"].astype(jnp.bfloat16),
                         preferred_element_type=jnp.float32) + params["bc"]

    assert probs.shape == (B, ACT_DIM) and values.shape == (B, 1)
    assert jnp.allclose(probs, probs_ref, atol=2e-3), "probs mismatch"
    assert jnp.allclose(values, values_ref, atol=5e-3), "values mismatch"
    assert jnp.allclose(jnp.sum(probs, axis=-1), 1.0, atol=2e-3), "probs not normalized"

    print("KERNEL_OK")
</pallas_src>

<mosaic_0001>
module attributes {stable_mosaic.version = 11 : i64} {
  func.func @actor_critic_kernel(%arg0: i32, %arg1: memref<256x128xf32, #tpu.memory_space<vmem>>, %arg2: memref<256x256xi8, #tpu.memory_space<vmem>>, %arg3: memref<128x128xbf16, #tpu.memory_space<vmem>>, %arg4: memref<1x128xf32, #tpu.memory_space<vmem>>, %arg5: memref<128x256xbf16, #tpu.memory_space<vmem>>, %arg6: memref<1x256xf32, #tpu.memory_space<vmem>>, %arg7: memref<256x256xf32, #tpu.memory_space<vmem>>) attributes {dimension_semantics = [#tpu.dimension_semantics<parallel>], iteration_bounds = array<i64: 2>, scalar_prefetch = 0 : i64, scratch_operands = 0 : i64, tpu.core_type = #tpu.core_type<tc>, window_params = [{transform_indices = @transform_0, window_bounds = array<i64: 256, 128>}, {transform_indices = @transform_1, window_bounds = array<i64: 256, 256>}, {pipeline_mode = #tpu.pipeline_mode<synchronous>, transform_indices = @transform_2, window_bounds = array<i64: 128, 128>}, {pipeline_mode = #tpu.pipeline_mode<synchronous>, transform_indices = @transform_3, window_bounds = array<i64: 1, 128>}, {pipeline_mode = #tpu.pipeline_mode<synchronous>, transform_indices = @transform_4, window_bounds = array<i64: 128, 256>}, {pipeline_mode = #tpu.pipeline_mode<synchronous>, transform_indices = @transform_5, window_bounds = array<i64: 1, 256>}, {transform_indices = @transform_6, window_bounds = array<i64: 256, 256>}]} {
    %c0 = arith.constant 0 : index
    %c0_0 = arith.constant 0 : index
    %0 = vector.load %arg1[%c0, %c0_0] : memref<256x128xf32, #tpu.memory_space<vmem>>, vector<256x128xf32>
    %1 = arith.truncf %0 : vector<256x128xf32> to vector<256x128xbf16>
    %c0_1 = arith.constant 0 : index
    %c0_2 = arith.constant 0 : index
    %2 = vector.load %arg3[%c0_1, %c0_2] : memref<128x128xbf16, #tpu.memory_space<vmem>>, vector<128x128xbf16>
    %cst = arith.constant dense<0.000000e+00> : vector<256x128xf32>
    %3 = tpu.matmul %1, %2, %cst {dimension_numbers = #tpu.dot_dimension_numbers<[1], [0], [0], [1], [0, 0, 1, 1], [], []>} : vector<256x128xbf16>, vector<128x128xbf16>, vector<256x128xf32> -> vector<256x128xf32>
    %c0_3 = arith.constant 0 : index
    %c0_4 = arith.constant 0 : index
    %4 = vector.load %arg4[%c0_3, %c0_4] : memref<1x128xf32, #tpu.memory_space<vmem>>, vector<1x128xf32>
    %5 = vector.broadcast %4 : vector<1x128xf32> to vector<256x128xf32>
    %6 = arith.addf %3, %5 : vector<256x128xf32>
    %7 = arith.truncf %6 : vector<256x128xf32> to vector<256x128xbf16>
    %c0_5 = arith.constant 0 : index
    %c0_6 = arith.constant 0 : index
    %8 = vector.load %arg5[%c0_5, %c0_6] : memref<128x256xbf16, #tpu.memory_space<vmem>>, vector<128x256xbf16>
    %cst_7 = arith.constant dense<0.000000e+00> : vector<256x256xf32>
    %9 = tpu.matmul %7, %8, %cst_7 {dimension_numbers = #tpu.dot_dimension_numbers<[1], [0], [0], [1], [0, 0, 1, 1], [], []>} : vector<256x128xbf16>, vector<128x256xbf16>, vector<256x256xf32> -> vector<256x256xf32>
    %c0_8 = arith.constant 0 : index
    %c0_9 = arith.constant 0 : index
    %10 = vector.load %arg6[%c0_8, %c0_9] : memref<1x256xf32, #tpu.memory_space<vmem>>, vector<1x256xf32>
    %11 = vector.broadcast %10 : vector<1x256xf32> to vector<256x256xf32>
    %12 = arith.addf %9, %11 : vector<256x256xf32>
    %c0_10 = arith.constant 0 : index
    %c0_11 = arith.constant 0 : index
    %13 = vector.load %arg2[%c0_10, %c0_11] : memref<256x256xi8, #tpu.memory_space<vmem>>, vector<256x256xi8>
    %c0_i8 = arith.constant 0 : i8
    %14 = vector.broadcast %c0_i8 : i8 to vector<256x256xi8>
    %15 = arith.cmpi ne, %13, %14 : vector<256x256xi8>
    %cst_12 = arith.constant -1.000000e+10 : f32
    %16 = vector.broadcast %cst_12 : f32 to vector<256x256xf32>
    %17 = arith.select %15, %12, %16 : vector<256x256xi1>, vector<256x256xf32>
    %cst_13 = arith.constant dense<0xFF800000> : vector<256xf32>
    %18 = vector.multi_reduction <maximumf>, %17, %cst_13 [1] : vector<256x256xf32> to vector<256xf32>
    %19 = vector.shape_cast %18 : vector<256xf32> to vector<256x1xf32>
    %20 = vector.broadcast %19 : vector<256x1xf32> to vector<256x256xf32>
    %21 = arith.subf %17, %20 : vector<256x256xf32>
    %22 = math.exp %21 : vector<256x256xf32>
    %cst_14 = arith.constant dense<0.000000e+00> : vector<256xf32>
    %23 = vector.multi_reduction <add>, %22, %cst_14 [1] : vector<256x256xf32> to vector<256xf32>
    %24 = vector.shape_cast %23 : vector<256xf32> to vector<256x1xf32>
    %25 = tpu.reciprocal %24 {approx = true} : vector<256x1xf32> -> vector<256x1xf32>
    %26 = vector.broadcast %25 : vector<256x1xf32> to vector<256x256xf32>
    %27 = arith.mulf %22, %26 : vector<256x256xf32>
    %28 = tpu.iota {dimensions = array<i32: 1>} : vector<256x256xi32>
    %c250_i32 = arith.constant 250 : i32
    %29 = vector.broadcast %c250_i32 : i32 to vector<256x256xi32>
    %30 = arith.cmpi eq, %28, %29 : vector<256x256xi32>
    %31 = arith.select %30, %12, %27 : vector<256x256xi1>, vector<256x256xf32>
    %c0_15 = arith.constant 0 : index
    %c0_16 = arith.constant 0 : index
    %32 = vector.load %arg7[%c0_15, %c0_16] : memref<256x256xf32, #tpu.memory_space<vmem>>, vector<256x256xf32>
    tpu.vector_store %arg7[%c0_15, %c0_16], %31 {strides = array<i32>} : memref<256x256xf32, #tpu.memory_space<vmem>>, vector<256x256xf32>,
    return
  }
  func.func @transform_0(%arg0: i32) -> (i32, i32) {
    %c0_i32 = arith.constant 0 : i32
    %c0_i32_0 = arith.constant 0 : i32
    return %arg0, %c0_i32 : i32, i32
  }
  func.func @transform_1(%arg0: i32) -> (i32, i32) {
    %c0_i32 = arith.constant 0 : i32
    %c0_i32_0 = arith.constant 0 : i32
    return %arg0, %c0_i32 : i32, i32
  }
  func.func @transform_2(%arg0: i32) -> (i32, i32) {
    %c0_i32 = arith.constant 0 : i32
    %c0_i32_0 = arith.constant 0 : i32
    %c0_i32_1 = arith.constant 0 : i32
    return %c0_i32, %c0_i32_0 : i32, i32
  }
  func.func @transform_3(%arg0: i32) -> (i32, i32) {
    %c0_i32 = arith.constant 0 : i32
    %c0_i32_0 = arith.constant 0 : i32
    %c0_i32_1 = arith.constant 0 : i32
    return %c0_i32, %c0_i32_0 : i32, i32
  }
  func.func @transform_4(%arg0: i32) -> (i32, i32) {
    %c0_i32 = arith.constant 0 : i32
    %c0_i32_0 = arith.constant 0 : i32
    %c0_i32_1 = arith.constant 0 : i32
    return %c0_i32, %c0_i32_0 : i32, i32
  }
  func.func @transform_5(%arg0: i32) -> (i32, i32) {
    %c0_i32 = arith.constant 0 : i32
    %c0_i32_0 = arith.constant 0 : i32
    %c0_i32_1 = arith.constant 0 : i32
    return %c0_i32, %c0_i32_0 : i32, i32
  }
  func.func @transform_6(%arg0: i32) -> (i32, i32) {
    %c0_i32 = arith.constant 0 : i32
    %c0_i32_0 = arith.constant 0 : i32
    return %arg0, %c0_i32 : i32, i32
  }
}

</mosaic_0001>

<bundles_post_ra>
// kernel: actor_critic_forward.1
= control target key start
LH: loop header
LB: loop body
LE: loop exit
PB: predicated region body
PF: predicated region fallthrough
CT: control target
= control target key end

     0   :  { %s2404_s21 = smov 0   ;;  %s4031_s0 = inlined_call_operand.vmem [shape: f32[512,128], index: 0, kind: input, shape index: {}]   ;;  %s4032_s1 = inlined_call_operand.vmem [shape: s8[512,256], index: 1, kind: input, shape index: {}]   ;;  %s4033_s2 = inlined_call_operand.vmem [shape: bf16[128,128], index: 2, kind: input, shape index: {}]   ;;  %s4034_s3 = inlined_call_operand.vmem [shape: f32[1,128], index: 3, kind: input, shape index: {}]   ;;  %s4035_s4 = inlined_call_operand.vmem [shape: bf16[128,256], index: 4, kind: input, shape index: {}]   ;;  %s4036_s5 = inlined_call_operand.vmem [shape: f32[1,256], index: 5, kind: input, shape index: {}]   ;;  %s4037_s6 = inlined_call_operand.vmem [shape: f32[512,256], index: 6, kind: output, shape index: {}]  }
   0x1 LB: > { %s1997_s22 = sadd.s32 4294967295, %s2366_s21   ;;  %p2001_p0 = scmp.ge.s32.totalorder %s2366_s21, 1  ;;  %s2366_s21 = sphi %s2404_s21, %s16_s21  }
   0x2   : > { %p225_p1 = scmp.lt.s32.totalorder %s2366_s21, 3 }
   0x4   : > { %p226_p2 = pnand %p2001_p0, %p225_p1 }
   0x6   : > { %229 = sbr.rel (%p226_p2) target bundleno = 870 (0x366), region = 44 }
   0xb   : > { %v2136_v0 = vld [vmem:[%s4033_s2 + $0x38] sm:$0xff]   ;;  %s2002_s25 = sshll.u32 %s1997_s22, 5  ;;  %v2137_v1 = vld [vmem:[%s4033_s2 + $0x30] sm:$0xff]   ;;  %v2138_v2 = vld [vmem:[%s4033_s2 + $0x28] sm:$0xff]   ;;  %s2004_s13 = sshll.u32 %s1997_s22, 3 }
   0xc   : > { %p263_p3 = scmp.lt.s32.totalorder %s2002_s25, 63  ;;  %2063 = vmatprep.subr.bf16.mxu0 %v2136_v0  ;;  %v2139_v3 = vld [vmem:[%s4033_s2 + $0x20] sm:$0xff]   ;;  %v2140_v7 = vld [vmem:[%s4033_s2 + $0x18] sm:$0xff]   ;;  %v2141_v8 = vld [vmem:[%s4033_s2 + $0x10] sm:$0xff]   ;;  %p269_p4 = scmp.lt.s32.totalorder %s2004_s13, 15 }
   0xd   : > { %2064 = vmatpush3.bf16.msra.mxu0 %v2136_v0  ;;  %v2142_v9 = vld [vmem:[%s4033_s2 + $0x8] sm:$0xff]   ;;  %v2146_v10 = vld [vmem:[%s4035_s4 + $0x74] ss:$8 sps:$4 sm:$0xff]   ;;  %v2144_v11 = vld [vmem:[%s4035_s4 + $0x70] ss:$8 sps:$4 sm:$0xff]  }
   0xe   : > { %s4353_s25 = smov (!%p263_p3, %s2002_s25), 63  ;;  %2065 = vmatprep.subr.bf16.mxu0 %v2137_v1  ;;  %v2149_v12 = vld [vmem:[%s4035_s4 + $0x64] ss:$8 sps:$4 sm:$0xff]   ;;  %2111 = vmatprep.subr.bf16.mxu1 %v2146_v10  ;;  %v2147_v14 = vld [vmem:[%s4035_s4 + $0x60] ss:$8 sps:$4 sm:$0xff]   ;;  %s4355_s13 = smov (!%p269_p4, %s2004_s13), 15 }
   0xf   : > { %s2003_s30 = sshll.u32 %s4353_s25, 3  ;;  %2119 = vmatpush1.bf16.msra.mxu1 %v2144_v11  ;;  %v2143_v13 = vld [vmem:[%s4033_s2] sm:$0xff]   ;;  %v2152_v15 = vld [vmem:[%s4035_s4 + $0x54] ss:$8 sps:$4 sm:$0xff]   ;;  %v2150_v20 = vld [vmem:[%s4035_s4 + $0x50] ss:$8 sps:$4 sm:$0xff]  }
  0x10   : > { %s2429_s9 = scalar_lea.vmem %s4031_s0, %s2003_s30  ;;  %2112 = vmatprep.subr.bf16.mxu1 %v2149_v12  ;;  %v2155_v21 = vld [vmem:[%s4035_s4 + $0x44] ss:$8 sps:$4 sm:$0xff]   ;;  %v2153_v24 = vld [vmem:[%s4035_s4 + $0x40] ss:$8 sps:$4 sm:$0xff]   ;;  %v2158_v25 = vld [vmem:[%s4035_s4 + $0x34] ss:$8 sps:$4 sm:$0xff]  }
  0x11   : > { %2066 = vmatpush3.bf16.msra.mxu0 %v2137_v1  ;;  %v285_v4 = vld [vmem:[%s2429_s9] sm:$0xff]  ;;  %v286_v5 = vld [vmem:[%s2429_s9 + $0x8] sm:$0xff]  ;;  %v287_v16 = vld [vmem:[%s2429_s9 + $0x10] sm:$0xff]  ;;  %s2037_s14 = sshll.u32 %s4355_s13, 4  ;;  %s2038_s19 = sshll.u32 %s4353_s25, 4 }
  0x12   : > { %2067 = vmatprep.subr.bf16.mxu0 %v2138_v2  ;;  %v317_v6 = vpack.c.bf16 %v286_v5, %v285_v4  ;;  %v288_v17 = vld [vmem:[%s2429_s9 + $0x18] sm:$0xff]  ;;  %v289_v18 = vld [vmem:[%s2429_s9 + $0x20] sm:$0xff]  ;;  %v290_v19 = vld [vmem:[%s2429_s9 + $0x28] sm:$0xff]  ;;  %s2584_s17 = scalar_lea.vmem %s4032_s1, %s2037_s14  ;;  %s3801_s24 = scalar_lea.vmem %s4037_s6, %s2038_s19 }
  0x13   : > { %2120 = vmatpush1.bf16.msra.mxu1 %v2147_v14  ;;  %v318_v22 = vpack.c.bf16 %v288_v17, %v287_v16  ;;  %v319_v23 = vpack.c.bf16 %v290_v19, %v289_v18  ;;  %v291_v26 = vld [vmem:[%s2429_s9 + $0x30] sm:$0xff]  ;;  %v292_v27 = vld [vmem:[%s2429_s9 + $0x38] sm:$0xff]  ;;  %v293_v28 = vld [vmem:[%s2429_s9 + $0x40] sm:$0xff] }
  0x14   : > { %2079 = vmatprep.mubr.bf16.mxu0 %v317_v6  ;;  %2113 = vmatprep.subr.bf16.mxu1 %v2152_v15  ;;  %v294_v29 = vld [vmem:[%s2429_s9 + $0x48] sm:$0xff]  ;;  %v2156_v30 = vld [vmem:[%s4035_s4 + $0x30] ss:$8 sps:$4 sm:$0xff]   ;;  %v320_v32 = vpack.c.bf16 %v292_v27, %v291_v26  ;;  %v297_v37 = vld [vmem:[%s2429_s9 + $0x60] sm:$0xff] }
  0x15   : > { %2068 = vmatpush3.bf16.msra.mxu0 %v2138_v2  ;;  %v2161_v31 = vld [vmem:[%s4035_s4 + $0x24] ss:$8 sps:$4 sm:$0xff]   ;;  %v321_v33 = vpack.c.bf16 %v294_v29, %v293_v28  ;;  %v2159_v34 = vld [vmem:[%s4035_s4 + $0x20] ss:$8 sps:$4 sm:$0xff]   ;;  %v295_v35 = vld [vmem:[%s2429_s9 + $0x50] sm:$0xff] }
  0x16   : > { %2069 = vmatprep.subr.bf16.mxu0 %v2139_v3  ;;  %v296_v36 = vld [vmem:[%s2429_s9 + $0x58] sm:$0xff]  ;;  %v298_v38 = vld [vmem:[%s2429_s9 + $0x68] sm:$0xff]  ;;  %v299_v41 = vld [vmem:[%s2429_s9 + $0x70] sm:$0xff] }
  0x17   : > { %2121 = vmatpush1.bf16.msra.mxu1 %v2150_v20  ;;  %v322_v39 = vpack.c.bf16 %v296_v36, %v295_v35  ;;  %v323_v40 = vpack.c.bf16 %v298_v38, %v297_v37  ;;  %v300_v42 = vld [vmem:[%s2429_s9 + $0x78] sm:$0xff]  ;;  %v301_v43 = vld [vmem:[%s2429_s9 + $0x80] sm:$0xff]  ;;  %v302_v44 = vld [vmem:[%s2429_s9 + $0x88] sm:$0xff] }
  0x18   : > { %2114 = vmatprep.subr.bf16.mxu1 %v2155_v21  ;;  %v324_v45 = vpack.c.bf16 %v300_v42, %v299_v41  ;;  %v325_v46 = vpack.c.bf16 %v302_v44, %v301_v43  ;;  %v303_v47 = vld [vmem:[%s2429_s9 + $0x90] sm:$0xff]  ;;  %v304_v48 = vld [vmem:[%s2429_s9 + $0x98] sm:$0xff]  ;;  %v305_v49 = vld [vmem:[%s2429_s9 + $0xa0] sm:$0xff] }
  0x19   : > { %2070 = vmatpush3.bf16.msra.mxu0 %v2139_v3  ;;  %v306_v50 = vld [vmem:[%s2429_s9 + $0xa8] sm:$0xff]  ;;  %v326_v51 = vpack.c.bf16 %v304_v48, %v303_v47  ;;  %v307_v53 = vld [vmem:[%s2429_s9 + $0xb0] sm:$0xff]  ;;  %v308_v54 = vld [vmem:[%s2429_s9 + $0xb8] sm:$0xff] }
  0x1a   : > { %2071 = vmatprep.subr.bf16.mxu0 %v2140_v7  ;;  %v327_v52 = vpack.c.bf16 %v306_v50, %v305_v49  ;;  %v309_v55 = vld [vmem:[%s2429_s9 + $0xc0] sm:$0xff]  ;;  %v310_v56 = vld [vmem:[%s2429_s9 + $0xc8] sm:$0xff]  ;;  %v328_v57 = vpack.c.bf16 %v308_v54, %v307_v53  ;;  %v311_v59 = vld [vmem:[%s2429_s9 + $0xd0] sm:$0xff] }
  0x1b   : > { %2122 = vmatpush1.bf16.msra.mxu1 %v2153_v24  ;;  %v329_v58 = vpack.c.bf16 %v310_v56, %v309_v55  ;;  %v312_v60 = vld [vmem:[%s2429_s9 + $0xd8] sm:$0xff]  ;;  %v313_v61 = vld [vmem:[%s2429_s9 + $0xe0] sm:$0xff]  ;;  %v314_v62 = vld [vmem:[%s2429_s9 + $0xe8] sm:$0xff] }
  0x1c   : > { %2115 = vmatprep.subr.bf16.mxu1 %v2158_v25  ;;  %v330_v63 = vpack.c.bf16 %v312_v60, %v311_v59  ;;  %v331_v0 = vpack.c.bf16 %v314_v62, %v313_v61  ;;  %v315_v1 = vld [vmem:[%s2429_s9 + $0xf0] sm:$0xff]  ;;  %v316_v2 = vld [vmem:[%s2429_s9 + $0xf8] sm:$0xff]  ;;  %v2167_v6 = vld [vmem:[%s4035_s4 + $0x4] ss:$8 sps:$4 sm:$0xff]  }
  0x1d   : > { %2072 = vmatpush3.bf16.msra.mxu0 %v2140_v7  ;;  %v332_v3 = vpack.c.bf16 %v316_v2, %v315_v1  ;;  %v2164_v4 = vld [vmem:[%s4035_s4 + $0x14] ss:$8 sps:$4 sm:$0xff]   ;;  %v2162_v5 = vld [vmem:[%s4035_s4 + $0x10] ss:$8 sps:$4 sm:$0xff]   ;;  %v2165_v7 = vld [vmem:[%s4035_s4] ss:$8 sps:$4 sm:$0xff]  }
  0x1e   : > { %2073 = vmatprep.subr.bf16.mxu0 %v2141_v8 }
  0x1f   : > { %2123 = vmatpush1.bf16.msra.mxu1 %v2156_v30 }
  0x20   : > { %2116 = vmatprep.subr.bf16.mxu1 %v2161_v31 }
  0x21   : > { %2074 = vmatpush3.bf16.msra.mxu0 %v2141_v8  ;;  %v4039_v8 = vmov 0  }
  0x22   : > { %2075 = vmatprep.subr.bf16.mxu0 %v2142_v9  ;;  %761 = vmatprep.mubr.bf16.mxu1 %v4039_v8 }
  0x23   : > { %2124 = vmatpush1.bf16.msra.mxu1 %v2159_v34 }
  0x24   : > { %2117 = vmatprep.subr.bf16.mxu1 %v2164_v4 }
  0x25   : > { %2076 = vmatpush3.bf16.msra.mxu0 %v2142_v9 }
  0x26   : > { %2077 = vmatprep.subr.bf16.mxu0 %v2143_v13 }
  0x27   : > { %2125 = vmatpush1.bf16.msra.mxu1 %v2162_v5 }
  0x28   : > { %2118 = vmatprep.subr.bf16.mxu1 %v2167_v6 }
  0x29   : > { %2078 = vmatpush3.bf16.msra.mxu0 %v2143_v13 }
  0x2a   : > { %689 = vmatprep.subr.bf16.mxu0 %v2146_v10 }
  0x2b   : > { %2126 = vmatpush1.bf16.msra.mxu1 %v2165_v7 }
  0x2c   : > { %2080 = vmatmul.mubr.bf16.vlgmr.msra.gmra.mxu0 %v318_v22 }
  0x2d   : > { %2083 = vmatprep.mubr.bf16.mxu0 %v319_v23  ;;  %690 = vmatpush1.bf16.msra.mxu0 %v2144_v11 }
  0x2e   : > { %691 = vmatprep.subr.bf16.mxu0 %v2149_v12  ;;  %v2531_v12 = vld [vmem:[%s4034_s3] ss:$0 sm:$0xff] }
  0x31   : > { %692 = vmatpush1.bf16.msra.mxu0 %v2147_v14 }
  0x32   : > { %693 = vmatprep.subr.bf16.mxu0 %v2152_v15 }
  0x34   : > { %2084 = vmatmul.mubr.bf16.gmra.mxu0 %v320_v32 }
  0x35   : > { %2087 = vmatprep.mubr.bf16.mxu0 %v321_v33  ;;  %694 = vmatpush1.bf16.msra.mxu0 %v2150_v20 }
  0x36   : > { %695 = vmatprep.subr.bf16.mxu0 %v2155_v21 }
  0x39   : > { %696 = vmatpush1.bf16.msra.mxu0 %v2153_v24 }
  0x3a   : > { %697 = vmatprep.subr.bf16.mxu0 %v2158_v25 }
  0x3c   : > { %2088 = vmatmul.mubr.bf16.gmra.mxu0 %v322_v39 }
  0x3d   : > { %2091 = vmatprep.mubr.bf16.mxu0 %v323_v40  ;;  %698 = vmatpush1.bf16.msra.mxu0 %v2156_v30 }
  0x3e   : > { %699 = vmatprep.subr.bf16.mxu0 %v2161_v31 }
  0x41   : > { %700 = vmatpush1.bf16.msra.mxu0 %v2159_v34 }
  0x42   : > { %701 = vmatprep.subr.bf16.mxu0 %v2164_v4 }
  0x44   : > { %2092 = vmatmul.mubr.bf16.gmra.mxu0 %v324_v45 }
  0x45   : > { %2095 = vmatprep.mubr.bf16.mxu0 %v325_v46  ;;  %702 = vmatpush1.bf16.msra.mxu0 %v2162_v5 }
  0x46   : > { %703 = vmatprep.subr.bf16.mxu0 %v2167_v6 }
  0x49   : > { %704 = vmatpush1.bf16.msra.mxu0 %v2165_v7 }
  0x4c   : > { %2096 = vmatmul.mubr.bf16.gmra.mxu0 %v326_v51 }
  0x4d   : > { %2099 = vmatprep.mubr.bf16.mxu0 %v327_v52 }
  0x54   : > { %2100 = vmatmul.mubr.bf16.gmra.mxu0 %v328_v57 }
  0x55   : > { %2103 = vmatprep.mubr.bf16.mxu0 %v329_v58 }
  0x5c   : > { %2104 = vmatmul.mubr.bf16.gmra.mxu0 %v330_v63 }
  0x5d   : > { %2107 = vmatprep.mubr.bf16.mxu0 %v331_v0 }
  0x64   : > { %2108 = vmatmul.mubr.bf16.gmra.mxu0 %v332_v3 }
  0x65   : > { %721 = vmatprep.mubr.bf16.mxu0 %v4039_v8 }
  0xec   : > { %v2081_v9 = vpop.f32.mrf.mxu0 }
  0xed   : > { %v447_v22 = vadd.f32 %v2081_v9, %v2531_v12 }
  0xee   : > { %v438_v10 = vpop.f32.mrf.mxu0 }
  0xef   : > { %v439_v14 = vadd.f32 %v2531_v12, %v438_v10 }
  0xf0   : > { %v2082_v11 = vpop.f32.mrf.mxu0 }
  0xf1   : > { %v450_v20 = vadd.f32 %v2082_v11, %v2531_v12 }
  0xf2   : > { %v441_v13 = vpop.f32.mrf.mxu0 }
  0xf3   : > { %v442_v15 = vadd.f32 %v2531_v12, %v441_v13  ;;  %v566_v24 = vpack.c.bf16 %v450_v20, %v447_v22 }
  0xf4   : > { %v2085_v16 = vpop.f32.mrf.mxu0 }
  0xf5   : > { %v565_v17 = vpack.c.bf16 %v442_v15, %v439_v14  ;;  %v463_v39 = vadd.f32 %v2085_v16, %v2531_v12 }
  0xf6   : > { %v454_v18 = vpop.f32.mrf.mxu0 }
  0xf7   : > { %722 = vmatmul.mubr.bf16.vlgmr.msra.gmra.mxu0 %v565_v17  ;;  %v455_v29 = vadd.f32 %v2531_v12, %v454_v18 }
  0xf8   : > { %v2086_v19 = vpop.f32.mrf.mxu0  ;;  %731 = vmatprep.mubr.bf16.mxu0 %v4039_v8 }
  0xf9   : > { %v466_v36 = vadd.f32 %v2086_v19, %v2531_v12 }
  0xfa   : > { %v457_v21 = vpop.f32.mrf.mxu0 }
  0xfb   : > { %v458_v27 = vadd.f32 %v2531_v12, %v457_v21  ;;  %v568_v41 = vpack.c.bf16 %v466_v36, %v463_v39 }
  0xfc   : > { %v2089_v23 = vpop.f32.mrf.mxu0 }
  0xfd   : > { %v567_v33 = vpack.c.bf16 %v458_v27, %v455_v29  ;;  %v479_v40 = vadd.f32 %v2089_v23, %v2531_v12  ;;  %v883_v29 = vld [vmem:[%s2584_s17 + $0x8] sm:$0xff] }
  0xfe   : > { %v470_v25 = vpop.f32.mrf.mxu0  ;;  %vm899_vm1 = vnez %v883_v29 }
  0xff   : > { %732 = vmatmul.mubr.bf16.gmra.mxu0 %v566_v24  ;;  %v471_v30 = vadd.f32 %v2531_v12, %v470_v25 }
 0x100   : > { %v2090_v26 = vpop.f32.mrf.mxu0  ;;  %741 = vmatprep.mubr.bf16.mxu0 %v4039_v8 }
 0x101   : > { %v482_v37 = vadd.f32 %v2090_v26, %v2531_v12 }
 0x102   : > { %v473_v28 = vpop.f32.mrf.mxu0 }
 0x103   : > { %v474_v31 = vadd.f32 %v2531_v12, %v473_v28  ;;  %v570_v42 = vpack.c.bf16 %v482_v37, %v479_v40  ;;  %v882_v28 = vld [vmem:[%s2584_s17] sm:$0xff] }
 0x104   : > { %v2093_v32 = vpop.f32.mrf.mxu0  ;;  %vm898_vm0 = vnez %v882_v28  ;;  %v886_v40 = vld [vmem:[%s2584_s17 + $0x20] sm:$0xff]  ;;  %v889_v28 = vld [vmem:[%s2584_s17 + $0x38] sm:$0xff] }
 0x105   : > { %v569_v34 = vpack.c.bf16 %v474_v31, %v471_v30  ;;  %v495_v49 = vadd.f32 %v2093_v32, %v2531_v12  ;;  %v915_v30 = vsel %vm899_vm1, 16843009, %v4039_v8  ;;  %vm902_vm4 = vnez %v886_v40 }
 0x106   : > { %v486_v35 = vpop.f32.mrf.mxu0  ;;  %v931_v32 = vunpack.c.0.s8 %v915_v30  ;;  %v933_v36 = vunpack.c.1.s8 %v915_v30  ;;  %v935_v39 = vunpack.c.2.s8 %v915_v30  ;;  %vm905_vm14 = vnez %v889_v28 }
 0x107   : > { %742 = vmatmul.mubr.bf16.gmra.mxu0 %v567_v33  ;;  %762 = vmatmul.mubr.bf16.vlgmr.msra.gmra.mxu1 %v569_v34  ;;  %v487_v44 = vadd.f32 %v2531_v12, %v486_v35  ;;  %v884_v33 = vld [vmem:[%s2584_s17 + $0x10] sm:$0xff]  ;;  %v885_v34 = vld [vmem:[%s2584_s17 + $0x18] sm:$0xff] }
 0x108   : > { %751 = vmatprep.mubr.bf16.mxu0 %v4039_v8  ;;  %771 = vmatprep.mubr.bf16.mxu1 %v4039_v8  ;;  %v2094_v38 = vpop.f32.mrf.mxu0  ;;  %vm900_vm2 = vnez %v884_v33  ;;  %vm901_vm3 = vnez %v885_v34 }
 0x109   : > { %v498_v50 = vadd.f32 %v2094_v38, %v2531_v12 }
 0x10a   : > { %v489_v43 = vpop.f32.mrf.mxu0 }
 0x10b   : > { %v490_v45 = vadd.f32 %v2531_v12, %v489_v43  ;;  %v572_v52 = vpack.c.bf16 %v498_v50, %v495_v49  ;;  %v916_v43 = vsel %vm900_vm2, 16843009, %v4039_v8  ;;  %v937_v49 = vunpack.c.3.s8 %v915_v30 }
 0x10c   : > { %v2097_v46 = vpop.f32.mrf.mxu0 }
 0x10d   : > { %v571_v47 = vpack.c.bf16 %v490_v45, %v487_v44  ;;  %v511_v59 = vadd.f32 %v2097_v46, %v2531_v12  ;;  %v917_v44 = vsel %vm901_vm3, 16843009, %v4039_v8  ;;  %v4038_v45 = vlaneseq }
 0x10e   : > { %v502_v48 = vpop.f32.mrf.mxu0 }
 0x10f   : > { %752 = vmatmul.mubr.bf16.gmra.mxu0 %v568_v41  ;;  %772 = vmatmul.mubr.bf16.gmra.mxu1 %v570_v42  ;;  %v503_v54 = vadd.f32 %v2531_v12, %v502_v48  ;;  %v887_v41 = vld [vmem:[%s2584_s17 + $0x28] sm:$0xff] }
 0x110   : > { %781 = vmatprep.mubr.bf16.mxu1 %v4039_v8  ;;  %v2098_v51 = vpop.f32.mrf.mxu0  ;;  %vm903_vm5 = vnez %v887_v41 }
 0x111   : > { %v514_v60 = vadd.f32 %v2098_v51, %v2531_v12  ;;  %v938_v51 = vunpack.c.0.s8 %v916_v43 }
 0x112   : > { %v505_v53 = vpop.f32.mrf.mxu0 }
 0x113   : > { %v506_v55 = vadd.f32 %v2531_v12, %v505_v53  ;;  %v574_v62 = vpack.c.bf16 %v514_v60, %v511_v59  ;;  %v2597_v53 = vsel %vm902_vm4, 16843009, %v4039_v8 }
 0x114   : > { %v2101_v56 = vpop.f32.mrf.mxu0  ;;  %v946_v59 = vunpack.c.0.s8 %v2597_v53  ;;  %v950_v30 = vunpack.c.2.s8 %v2597_v53 }
 0x115   : > { %v573_v57 = vpack.c.bf16 %v506_v55, %v503_v54  ;;  %v527_v5 = vadd.f32 %v2101_v56, %v2531_v12  ;;  %v2600_v54 = vsel %vm903_vm5, 16843009, %v4039_v8  ;;  %v600_v55 = vshrl.u32 %v4038_v45, 7 }
 0x116   : > { %v518_v58 = vpop.f32.mrf.mxu0  ;;  %v947_v60 = vunpack.c.0.s8 %v2600_v54 }
 0x117   : > { %782 = vmatmul.mubr.bf16.gmra.mxu1 %v571_v47  ;;  %v519_v0 = vadd.f32 %v2531_v12, %v518_v58 }
 0x118   : > { %791 = vmatprep.mubr.bf16.mxu1 %v4039_v8  ;;  %v2102_v61 = vpop.f32.mrf.mxu0 }
 0x119   : > { %v530_v6 = vadd.f32 %v2102_v61, %v2531_v12  ;;  %v940_v61 = vunpack.c.1.s8 %v916_v43 }
 0x11a   : > { %v521_v63 = vpop.f32.mrf.mxu0 }
 0x11b   : > { %v522_v1 = vadd.f32 %v2531_v12, %v521_v63  ;;  %v576_v9 = vpack.c.bf16 %v530_v6, %v527_v5  ;;  %v601_v63 = vsub.s32 0, %v600_v55  ;;  %v1010_v6 = vpack.c.b16 %v947_v60, %v946_v59 }
 0x11c   : > { %v2105_v2 = vpop.f32.mrf.mxu0 }
 0x11d   : > { %v575_v3 = vpack.c.bf16 %v522_v1, %v519_v0  ;;  %v543_v17 = vadd.f32 %v2105_v2, %v2531_v12 }
 0x11e   : > { %v534_v4 = vpop.f32.mrf.mxu0 }
 0x11f   : > { %792 = vmatmul.mubr.bf16.gmra.mxu1 %v572_v52  ;;  %v535_v11 = vadd.f32 %v2531_v12, %v534_v4  ;;  %v939_v52 = vunpack.c.0.s8 %v917_v44  ;;  %v597_v4 = vld [vmem:[%s4036_s5] sm:$0x3] }
 0x120   : > { %801 = vmatprep.mubr.bf16.mxu1 %v4039_v8  ;;  %v2106_v7 = vpop.f32.mrf.mxu0 }
 0x121   : > { %v546_v18 = vadd.f32 %v2106_v7, %v2531_v12  ;;  %v1002_v58 = vpack.c.b16 %v939_v52, %v938_v51  ;;  %v948_v7 = vunpack.c.1.s8 %v2597_v53  ;;  %v953_v51 = vunpack.c.3.s8 %v2600_v54 }
 0x122   : > { %v537_v10 = vpop.f32.mrf.mxu0 }
 0x123   : > { %v538_v13 = vadd.f32 %v2531_v12, %v537_v10  ;;  %v578_v20 = vpack.c.bf16 %v546_v18, %v543_v17  ;;  %v1003_v5 = vpack.c.b8 %v1002_v58, %v1002_v58  ;;  %v605_v10 = vsub.s32 1, %v600_v55 }
 0x124   : > { %v2109_v14 = vpop.f32.mrf.mxu0  ;;  %v944_v17 = vunpack.c.3.s8 %v916_v43  ;;  %v945_v18 = vunpack.c.3.s8 %v917_v44  ;;  %v2671_v55 = vsel %vm905_vm14, 16843009, %v4039_v8 }
 0x125   : > { %v577_v15 = vpack.c.bf16 %v538_v13, %v535_v11  ;;  %v559_v25 = vadd.f32 %v2109_v14, %v2531_v12  ;;  %v942_v13 = vunpack.c.2.s8 %v916_v43  ;;  %v943_v14 = vunpack.c.2.s8 %v917_v44 }
 0x126   : > { %v550_v16 = vpop.f32.mrf.mxu0  ;;  %vm2625_vm10 = vnez %v1003_v5 }
 0x127   : > { %802 = vmatmul.mubr.bf16.gmra.mxu1 %v573_v57  ;;  %v551_v22 = vadd.f32 %v2531_v12, %v550_v16  ;;  %v1094_v41 = vsel %vm2625_vm10, 16843009, %v4039_v8 }
 0x128   : > { %811 = vmatprep.mubr.bf16.mxu1 %v4039_v8  ;;  %v2110_v19 = vpop.f32.mrf.mxu0  ;;  %v1130_v59 = vunpack.c.0.s8 %v1094_v41 }
 0x129   : > { %v562_v26 = vadd.f32 %v2110_v19, %v2531_v12  ;;  %v2616_v19 = vrot.slane %v597_v4, %v601_v63 }
 0x12a   : > { %v553_v21 = vpop.f32.mrf.mxu0 }
 0x12b   : > { %v554_v23 = vadd.f32 %v2531_v12, %v553_v21  ;;  %v580_v27 = vpack.c.bf16 %v562_v26, %v559_v25  ;;  %v914_v12 = vsel %vm898_vm0, 16843009, %v4039_v8  ;;  %v1011_v25 = vpack.c.b8 %v1010_v6, %v1010_v6 }
 0x12c   : > { %v930_v31 = vunpack.c.0.s8 %v914_v12  ;;  %v932_v35 = vunpack.c.1.s8 %v914_v12  ;;  %v934_v38 = vunpack.c.2.s8 %v914_v12  ;;  %v936_v48 = vunpack.c.3.s8 %v914_v12 }
 0x12d   : > { %v579_v24 = vpack.c.bf16 %v554_v23, %v551_v22  ;;  %v1006_v12 = vpack.c.b16 %v943_v14, %v942_v13  ;;  %vm2657_vm1 = vnez %v1011_v25 }
 0x12e   : > { %v994_v37 = vpack.c.b16 %v931_v32, %v930_v31  ;;  %v996_v42 = vpack.c.b16 %v933_v36, %v932_v35  ;;  %v998_v47 = vpack.c.b16 %v935_v39, %v934_v38  ;;  %v1000_v57 = vpack.c.b16 %v937_v49, %v936_v48 }
 0x12f   : > { %812 = vmatmul.mubr.bf16.gmra.mxu1 %v574_v62  ;;  %v941_v62 = vunpack.c.1.s8 %v917_v44  ;;  %v951_v31 = vunpack.c.2.s8 %v2600_v54  ;;  %v2633_v32 = vrot.slane %v597_v4, %v605_v10  ;;  %v1008_v35 = vpack.c.b16 %v945_v18, %v944_v17 }
 0x130   : > { %821 = vmatprep.mubr.bf16.mxu1 %v4039_v8  ;;  %v995_v46 = vpack.c.b8 %v994_v37, %v994_v37  ;;  %v997_v50 = vpack.c.b8 %v996_v42, %v996_v42  ;;  %v999_v56 = vpack.c.b8 %v998_v47, %v998_v47  ;;  %v952_v48 = vunpack.c.3.s8 %v2597_v53 }
 0x131   : > { %v1004_v11 = vpack.c.b16 %v941_v62, %v940_v61  ;;  %v1014_v47 = vpack.c.b16 %v951_v31, %v950_v30  ;;  %v1098_v63 = vsel %vm2657_vm1, 16843009, %v4039_v8  ;;  %v955_v4 = vunpack.c.0.s8 %v2671_v55 }
 0x132   : > { %vm1058_vm6 = vnez %v995_v46  ;;  %vm1059_vm7 = vnez %v997_v50  ;;  %vm2607_vm8 = vnez %v999_v56  ;;  %v1007_v46 = vpack.c.b8 %v1006_v12, %v1006_v12 }
 0x133   : > { %v1090_v0 = vsel %vm1058_vm6, 16843009, %v4039_v8  ;;  %v1091_v1 = vsel %vm1059_vm7, 16843009, %v4039_v8  ;;  %v1092_v22 = vsel %vm2607_vm8, 16843009, %v4039_v8  ;;  %v1005_v29 = vpack.c.b8 %v1004_v11, %v1004_v11 }
 0x134   : > { %v1123_v16 = vunpack.c.1.s8 %v1090_v0  ;;  %v1125_v21 = vunpack.c.1.s8 %v1091_v1  ;;  %v1126_v36 = vunpack.c.0.s8 %v1092_v22  ;;  %v1127_v37 = vunpack.c.1.s8 %v1092_v22 }
 0x135   : > { %vm2661_vm2 = vnez %v1005_v29  ;;  %v1009_v50 = vpack.c.b8 %v1008_v35, %v1008_v35  ;;  %vm2697_vm6 = vnez %v1007_v46  ;;  %v1138_v22 = vunpack.c.0.s8 %v1098_v63 }
 0x136   : > { %vm2639_vm12 = vcmp.ne.s32.totalorder %v1123_v16, 0  ;;  %vm2647_vm0 = vcmp.ne.s32.totalorder %v1125_v21, 0  ;;  %vm2674_vm3 = vcmp.ne.s32.totalorder %v1126_v36, 0  ;;  %vm2678_vm4 = vcmp.ne.s32.totalorder %v1127_v37, 0 }
 0x137   : > { %822 = vmatmul.mubr.bf16.gmra.mxu1 %v575_v3  ;;  %v1001_v3 = vpack.c.b8 %v1000_v57, %v1000_v57  ;;  %v2685_v62 = vsel %vm2661_vm2, 16843009, %v4039_v8  ;;  %vm2703_vm7 = vnez %v1009_v50  ;;  %v1139_v23 = vunpack.c.1.s8 %v1098_v63  ;;  %v890_v63 = vld [vmem:[%s2584_s17 + $0x40] sm:$0xff] }
 0x138   : > { %831 = vmatprep.mubr.bf16.mxu1 %v4039_v8  ;;  %v1132_v21 = vunpack.c.0.s8 %v2685_v62  ;;  %v1133_v29 = vunpack.c.1.s8 %v2685_v62  ;;  %v2747_v12 = vsel %vm2703_vm7, 16843009, %v4039_v8 }
 0x139   : > { %vm2621_vm9 = vnez %v1001_v3  ;;  %v1136_v50 = vunpack.c.0.s8 %v2747_v12  ;;  %v1137_v53 = vunpack.c.1.s8 %v2747_v12 }
 0x13a   : > { %v1093_v40 = vsel %vm2621_vm9, 16843009, %v4039_v8  ;;  %vm2812_vm1 = vcmp.ne.s32.totalorder %v1133_v29, 0 }
 0x13b   : > { %v1128_v57 = vunpack.c.0.s8 %v1093_v40  ;;  %v1129_v58 = vunpack.c.1.s8 %v1093_v40 }
 0x13d   : > { %vm2721_vm8 = vcmp.ne.s32.totalorder %v1128_v57, 0  ;;  %vm2725_vm9 = vcmp.ne.s32.totalorder %v1129_v58, 0  ;;  %v959_v57 = vunpack.c.2.s8 %v2671_v55 }
 0x13f   : > { %832 = vmatmul.mubr.bf16.gmra.mxu1 %v576_v9  ;;  %v949_v9 = vunpack.c.1.s8 %v2600_v54  ;;  %v1131_v54 = vunpack.c.1.s8 %v1094_v41 }
 0x140   : > { %841 = vmatprep.mubr.bf16.mxu1 %v4039_v8 }
 0x141   : > { %v1012_v26 = vpack.c.b16 %v949_v9, %v948_v7  ;;  %v1015_v7 = vpack.c.b8 %v1014_v47, %v1014_v47  ;;  %v1016_v9 = vpack.c.b16 %v953_v51, %v952_v48 }
 0x143   : > { %v1013_v43 = vpack.c.b8 %v1012_v26, %v1012_v26  ;;  %v2741_v26 = vsel %vm2697_vm6, 16843009, %v4039_v8  ;;  %vm1068_vm10 = vnez %v1015_v7  ;;  %v1017_v30 = vpack.c.b8 %v1016_v9, %v1016_v9 }
 0x144   : > { %v1134_v39 = vunpack.c.0.s8 %v2741_v26  ;;  %v1135_v44 = vunpack.c.1.s8 %v2741_v26  ;;  %v2777_v46 = vsel %vm1068_vm10, 16843009, %v4039_v8 }
 0x145   : > { %vm2690_vm5 = vnez %v1013_v43  ;;  %vm2784_vm14 = vnez %v1017_v30  ;;  %v1143_v6 = vunpack.c.1.s8 %v2777_v46 }
 0x146   : > { %v2736_v25 = vsel %vm2690_vm5, 16843009, %v4039_v8  ;;  %v2825_v9 = vsel %vm2784_vm14, 16843009, %v4039_v8  ;;  %vm2861_vm10 = vcmp.ne.s32.totalorder %v1135_v44, 0 }
 0x147   : > { %842 = vmatmul.mubr.bf16.gmra.mxu1 %v577_v15  ;;  %v1122_v15 = vunpack.c.0.s8 %v1090_v0  ;;  %v1140_v38 = vunpack.c.0.s8 %v2736_v25  ;;  %v1141_v42 = vunpack.c.1.s8 %v2736_v25  ;;  %v891_v0 = vld [vmem:[%s2584_s17 + $0x48] sm:$0xff]  ;;  %v1144_v30 = vunpack.c.0.s8 %v2825_v9 }
 0x148   : > { %851 = vmatprep.mubr.bf16.mxu1 %v4039_v8  ;;  %vm907_vm5 = vnez %v891_v0 }
 0x149   : > { %vm2635_vm11 = vcmp.ne.s32.totalorder %v1122_v15, 0  ;;  %v957_v15 = vunpack.c.1.s8 %v2671_v55  ;;  %vm2853_vm7 = vcmp.ne.s32.totalorder %v1140_v38, 0 }
 0x14f   : > { %852 = vmatmul.mubr.bf16.gmra.mxu1 %v578_v20  ;;  %v1124_v20 = vunpack.c.0.s8 %v1091_v1 }
 0x150   : > { %861 = vmatprep.mubr.bf16.mxu1 %v4039_v8 }
 0x151   : > { %vm2643_vm15 = vcmp.ne.s32.totalorder %v1124_v20, 0 }
 0x157   : > { %862 = vmatmul.mubr.bf16.gmra.mxu1 %v579_v24 }
 0x158   : > { %871 = vmatprep.mubr.bf16.mxu1 %v4039_v8 }
 0x15f   : > { %872 = vmatmul.mubr.bf16.gmra.mxu1 %v580_v27  ;;  %v888_v27 = vld [vmem:[%s2584_s17 + $0x30] sm:$0xff] }
 0x160   : > { %vm904_vm13 = vnez %v888_v27 }
 0x161   : > { %v2668_v52 = vsel %vm904_vm13, 16843009, %v4039_v8  ;;  %vm2779_vm13 = vcmp.ne.s32.totalorder %v1139_v23, 0 }
 0x162   : > { %v954_v3 = vunpack.c.0.s8 %v2668_v52  ;;  %v956_v10 = vunpack.c.1.s8 %v2668_v52 }
 0x164   : > { %v1018_v27 = vpack.c.b16 %v955_v4, %v954_v3  ;;  %v1020_v35 = vpack.c.b16 %v957_v15, %v956_v10 }
 0x166   : > { %v1019_v47 = vpack.c.b8 %v1018_v27, %v1018_v27  ;;  %v1021_v62 = vpack.c.b8 %v1020_v35, %v1020_v35 }
 0x168   : > { %vm2827_vm2 = vnez %v1019_v47  ;;  %vm2847_vm6 = vnez %v1021_v62 }
 0x169   : > { %v1102_v35 = vsel %vm2827_vm2, 16843009, %v4039_v8  ;;  %vm2914_vm2 = vcmp.ne.s32.totalorder %v1136_v50, 0 }
 0x16a   : > { %v1146_v0 = vunpack.c.0.s8 %v1102_v35 }
 0x1b7   : > { %v723_v49 = vpop.f32.mrf.mxu0 }
 0x1b8   : > { %v724_v56 = vadd.f32 %v723_v49, %v2616_v19 }
 0x1b9   : > { %v725_v60 = vpop.f32.mrf.mxu0 }
 0x1ba   : > { %v2695_v1 = vadd.f32 %v725_v60, %v2633_v32  ;;  %v2711_v13 = vsel %vm2635_vm11, %v724_v56, -1e+10  ;;  %vm2761_vm11 = vcmp.ne.s32.totalorder %v1130_v59, 0  ;;  %v958_v56 = vunpack.c.2.s8 %v2668_v52 }
 0x1bb   : > { %v727_v5 = vpop.f32.mrf.mxu0 }
 0x1bc   : > { %4122 = vst [vmem:[#allocation2_spill] sm:$0xff] %v2695_v1  ;;  %v728_v11 = vadd.f32 %v727_v5, %v2616_v19  ;;  %v2716_v14 = vsel %vm2639_vm12, %v2695_v1, -1e+10  ;;  %vm2765_vm12 = vcmp.ne.s32.totalorder %v1131_v54, 0  ;;  %v1142_v5 = vunpack.c.0.s8 %v2777_v46 }
 0x1bd   : > { %v729_v16 = vpop.f32.mrf.mxu0  ;;  %v1314_v17 = vmax.f32 %v2711_v13, %v2716_v14 }
 0x1be   : > { %v2731_v24 = vadd.f32 %v729_v16, %v2633_v32  ;;  %v2752_v33 = vsel %vm2643_vm15, %v728_v11, -1e+10  ;;  %vm2800_vm15 = vcmp.ne.s32.totalorder %v1138_v22, 0  ;;  %v960_v11 = vunpack.c.3.s8 %v2668_v52 }
 0x1bf   : > { %v733_v28 = vpop.f32.mrf.mxu0  ;;  %1315 = vmax.xlane.f32.xlu0 %v1314_v17  ;;  %v961_v22 = vunpack.c.3.s8 %v2671_v55  ;;  %vm2906_vm14 = vcmp.ne.s32.totalorder %v1142_v5, 0  ;;  %v1147_v5 = vunpack.c.1.s8 %v1102_v35  ;;  %v892_v17 = vld [vmem:[%s2584_s17 + $0x50] sm:$0xff] }
 0x1c0   : > { %4131 = vst [vmem:[#allocation3_spill] sm:$0xff] %v2731_v24  ;;  %v734_v31 = vadd.f32 %v733_v28, %v2616_v19  ;;  %v2757_v34 = vsel %vm2647_vm0, %v2731_v24, -1e+10  ;;  %vm2808_vm0 = vcmp.ne.s32.totalorder %v1132_v21, 0  ;;  %v1022_v21 = vpack.c.b16 %v959_v57, %v958_v56 }
 0x1c1   : > { %v735_v36 = vpop.f32.mrf.mxu0  ;;  %v1317_v37 = vmax.f32 %v2752_v33, %v2757_v34  ;;  %v2894_v56 = vpack.c.b16 %v961_v22, %v960_v11 }
 0x1c2   : > { %v2773_v43 = vadd.f32 %v735_v36, %v2633_v32  ;;  %v2793_v59 = vsel %vm2674_vm3, %v734_v31, -1e+10  ;;  %vm2832_vm3 = vcmp.ne.s32.totalorder %v1141_v42, 0  ;;  %v1145_v31 = vunpack.c.1.s8 %v2825_v9 }
 0x1c3   : > { %v737_v48 = vpop.f32.mrf.mxu0  ;;  %1318 = vmax.xlane.f32.xlu0 %v1317_v37  ;;  %v2882_v42 = vsel %vm907_vm5, 16843009, %v4039_v8  ;;  %v1023_v51 = vpack.c.b8 %v1022_v21, %v1022_v21  ;;  %v1025_v49 = vpack.c.b8 %v2894_v56, %v2894_v56 }
 0x1c4   : > { %4136 = vst [vmem:[#allocation4_spill] sm:$0xff] %v2773_v43  ;;  %v738_v58 = vadd.f32 %v737_v48, %v2616_v19  ;;  %v2798_v60 = vsel %vm2678_vm4, %v2773_v43, -1e+10  ;;  %vm906_vm4 = vnez %v890_v63  ;;  %v2892_v48 = vsel %vm2847_vm6, 16843009, %v4039_v8 }
 0x1c5   : > { %v739_v2 = vpop.f32.mrf.mxu0  ;;  %v1320_v3 = vmax.f32 %v2793_v59, %v2798_v60  ;;  %v2878_v38 = vsel %vm906_vm4, 16843009, %v4039_v8  ;;  %v963_v10 = vunpack.c.0.s8 %v2882_v42  ;;  %v1148_v50 = vunpack.c.0.s8 %v2892_v48 }
 0x1c6   : > { %v2820_v7 = vadd.f32 %v739_v2, %v2633_v32  ;;  %v2840_v25 = vsel %vm2721_vm8, %v738_v58, -1e+10  ;;  %vm2857_vm8 = vcmp.ne.s32.totalorder %v1134_v39, 0  ;;  %v962_v9 = vunpack.c.0.s8 %v2878_v38 }
 0x1c7   : > { %v743_v15 = vpop.f32.mrf.mxu0  ;;  %v763_v16 = vpop.f32.mrf.mxu1  ;;  %1321 = vmax.xlane.f32.xlu1 %v1320_v3  ;;  %vm2945_vm4 = vnez %v1023_v51  ;;  %v964_v51 = vunpack.c.1.s8 %v2878_v38  ;;  %vm3027_vm5 = vnez %v1025_v49  ;;  %vm908_vm6 = vnez %v892_v17 }
 0x1c8   : > { %4147 = vst [vmem:[#allocation5_spill] sm:$0xff] %v2820_v7  ;;  %v744_v23 = vadd.f32 %v743_v15, %v2616_v19  ;;  %v2845_v52 = vsel %vm2725_vm9, %v2820_v7, -1e+10  ;;  %v764_v39 = vadd.f32 %v763_v16, %v2616_v19  ;;  %vm2885_vm9 = vcmp.ne.s32.totalorder %v1143_v6, 0 }
 0x1c9   : > { %v745_v27 = vpop.f32.mrf.mxu0  ;;  %v765_v28 = vpop.f32.mrf.mxu1  ;;  %v1323_v55 = vmax.f32 %v2840_v25, %v2845_v52 }
 0x1ca   : > { %v2871_v36 = vadd.f32 %v745_v27, %v2633_v32  ;;  %v2874_v37 = vadd.f32 %v765_v28, %v2633_v32  ;;  %v2899_v58 = vsel %vm2761_vm11, %v744_v23, -1e+10  ;;  %vm2918_vm11 = vcmp.ne.s32.totalorder %v1137_v53, 0 }
 0x1cb   : > { %v747_v44 = vpop.f32.mrf.mxu0  ;;  %v767_v46 = vpop.f32.mrf.mxu1  ;;  %1324 = vmax.xlane.f32.xlu1 %v1323_v55  ;;  %v2938_v21 = vsel %vm2800_vm15, %v764_v39, -1e+10  ;;  %v1149_v23 = vunpack.c.1.s8 %v2892_v48  ;;  %vm2970_vm15 = vcmp.ne.s32.totalorder %v1146_v0, 0  ;;  %v1026_v48 = vpack.c.b16 %v963_v10, %v962_v9 }
 0x1cc   : > { %4160 = vst [vmem:[#allocation6_spill] sm:$0xff] %v2871_v36  ;;  %4161 = vst [vmem:[#allocation7_spill] sm:$0xff] %v2874_v37  ;;  %v748_v57 = vadd.f32 %v747_v44, %v2616_v19  ;;  %v2904_v62 = vsel %vm2765_vm12, %v2871_v36, -1e+10  ;;  %v2933_v12 = vsel %vm2779_vm13, %v2874_v37, -1e+10  ;;  %v768_v27 = vadd.f32 %v767_v46, %v2616_v19 }
 0x1cd   : > { %v749_v2 = vpop.f32.mrf.mxu0  ;;  %v769_v3 = vpop.f32.mrf.mxu1  ;;  %v1326_v6 = vmax.f32 %v2899_v58, %v2904_v62  ;;  %vm2940_vm12 = vcmp.ne.s32.totalorder %v1145_v31, 0  ;;  %v1338_v44 = vmax.f32 %v2938_v21, %v2933_v12  ;;  %vm2966_vm13 = vcmp.ne.s32.totalorder %v1144_v30, 0 }
 0x1ce   : > { %v2925_v11 = vadd.f32 %v749_v2, %v2633_v32  ;;  %v2928_v15 = vadd.f32 %v769_v3, %v2633_v32  ;;  %v2955_v54 = vsel %vm2808_vm0, %v748_v57, -1e+10  ;;  %vm2974_vm0 = vcmp.ne.s32.totalorder %v1147_v5, 0 }
 0x1cf   : > { %v753_v53 = vpop.f32.mrf.mxu0  ;;  %v773_v16 = vpop.f32.mrf.mxu1  ;;  %1327 = vmax.xlane.f32.xlu0 %v1326_v6  ;;  %v965_v0 = vunpack.c.1.s8 %v2882_v42  ;;  %v2995_v5 = vsel %vm2945_vm4, 16843009, %v4039_v8  ;;  %v966_v9 = vunpack.c.2.s8 %v2878_v38  ;;  %v967_v10 = vunpack.c.2.s8 %v2882_v42 }
 0x1d0   : > { %4170 = vst [vmem:[#allocation8_spill] sm:$0xff] %v2925_v11  ;;  %4171 = vst [vmem:[#allocation9_spill] sm:$0xff] %v2928_v15  ;;  %v754_v28 = vadd.f32 %v753_v53, %v2616_v19  ;;  %v2960_v55 = vsel %vm2812_vm1, %v2925_v11, -1e+10  ;;  %v2988_v57 = vsel %vm2832_vm3, %v2928_v15, -1e+10  ;;  %v774_v2 = vadd.f32 %v773_v16, %v2616_v19 }
 0x1d1   : > { %v755_v31 = vpop.f32.mrf.mxu0  ;;  %v775_v35 = vpop.f32.mrf.mxu1  ;;  %v1329_v39 = vmax.f32 %v2955_v54, %v2960_v55  ;;  %v893_v53 = vld [vmem:[%s2584_s17 + $0x58] sm:$0xff]  ;;  %v3004_v16 = vsel %vm2853_vm7, %v768_v27, -1e+10  ;;  %vm3019_vm1 = vcmp.ne.s32.totalorder %v1148_v50, 0  ;;  %vm3023_vm3 = vcmp.ne.s32.totalorder %v1149_v23, 0  ;;  %v895_v11 = vld [vmem:[%s2584_s17 + $0x68] sm:$0xff] }
 0x1d2   : > { %v2980_v56 = vadd.f32 %v755_v31, %v2633_v32  ;;  %v2983_v30 = vadd.f32 %v775_v35, %v2633_v32  ;;  %v3008_v35 = vsel %vm2857_vm8, %v754_v28, -1e+10  ;;  %v1341_v45 = vmax.f32 %v3004_v16, %v2988_v57 }
 0x1d3   : > { %v757_v3 = vpop.f32.mrf.mxu0  ;;  %v777_v6 = vpop.f32.mrf.mxu1  ;;  %1330 = vmax.xlane.f32.xlu1 %v1329_v39  ;;  %1339 = vmax.xlane.f32.xlu0 %v1338_v44  ;;  %v1027_v27 = vpack.c.b8 %v1026_v48, %v1026_v48  ;;  %v1028_v23 = vpack.c.b16 %v965_v0, %v964_v51  ;;  %v3044_v49 = vsel %vm2906_vm14, %v774_v2, -1e+10  ;;  %v1030_v48 = vpack.c.b16 %v967_v10, %v966_v9 }
 0x1d4   : > { %4182 = vst [vmem:[#allocation10_spill] sm:$0xff] %v2980_v56  ;;  %4183 = vst [vmem:[#allocation11_spill] sm:$0xff] %v2983_v30  ;;  %v758_v31 = vadd.f32 %v757_v3, %v2616_v19  ;;  %v3013_v26 = vsel %vm2861_vm10, %v2980_v56, -1e+10  ;;  %v3040_v50 = vsel %vm2885_vm9, %v2983_v30, -1e+10  ;;  %vm909_vm7 = vnez %v893_v53 }
 0x1d5   : > { %v759_v39 = vpop.f32.mrf.mxu0  ;;  %v779_v44 = vpop.f32.mrf.mxu1  ;;  %v1332_v3 = vmax.f32 %v3008_v35, %v3013_v26  ;;  %v1344_v0 = vmax.f32 %v3044_v49, %v3040_v50  ;;  %v1150_v2 = vunpack.c.0.s8 %v2995_v5  ;;  %vm3074_vm8 = vnez %v1027_v27 }
 0x1d6   : > { %v3032_v28 = vadd.f32 %v759_v39, %v2633_v32  ;;  %v3035_v8 = vadd.f32 %v779_v44, %v2633_v32  ;;  %v778_v39 = vadd.f32 %v777_v6, %v2616_v19  ;;  %v3050_v47 = vsel %vm2914_vm2, %v758_v31, -1e+10 }
 0x1d7   : > { %v783_v56 = vpop.f32.mrf.mxu1  ;;  %1342 = vmax.xlane.f32.xlu1 %v1341_v45  ;;  %1333 = vmax.xlane.f32.xlu0 %v1332_v3  ;;  %v4193_v6 = vmov 0   ;;  %v1031_v3 = vpack.c.b8 %v1030_v48, %v1030_v48  ;;  %v968_v46 = vunpack.c.3.s8 %v2878_v38  ;;  %vm3111_vm10 = vcmp.ne.s32.totalorder %v1150_v2, 0 }
 0x1d8   : > { %4190 = vst [vmem:[#allocation12_spill] sm:$0xff] %v3032_v28  ;;  %4191 = vst [vmem:[#allocation13_spill] sm:$0xff] %v3035_v8  ;;  %v784_v44 = vadd.f32 %v783_v56, %v2616_v19  ;;  %v3055_v45 = vsel %vm2918_vm11, %v3032_v28, -1e+10  ;;  %v1151_v56 = vunpack.c.1.s8 %v2995_v5  ;;  %v3069_v41 = vsel %vm2940_vm12, %v3035_v8, -1e+10 }
 0x1d9   : > { %v785_v51 = vpop.f32.mrf.mxu1  ;;  %v1335_v63 = vmax.f32 %v3050_v47, %v3055_v45  ;;  %v1105_v9 = vsel %vm3027_vm5, 16843009, %v4193_v6  ;;  %v1029_v5 = vpack.c.b8 %v1028_v23, %v1028_v23  ;;  %v3084_v22 = vsel %vm909_vm7, 16843009, %v4193_v6 }
 0x1da   : > { %v3064_v40 = vadd.f32 %v785_v51, %v2633_v32  ;;  %v3080_v51 = vsel %vm908_vm6, 16843009, %v4193_v6  ;;  %v3089_v27 = vsel %vm2966_vm13, %v778_v39, -1e+10  ;;  %v969_v39 = vunpack.c.3.s8 %v2882_v42 }
 0x1db   : > { %v787_v31 = vpop.f32.mrf.mxu1  ;;  %1336 = vmax.xlane.f32.xlu1 %v1335_v63  ;;  %1345 = vmax.xlane.f32.xlu0 %v1344_v0  ;;  %v3093_v63 = vsel %vm2970_vm15, %v784_v44, -1e+10  ;;  %v1347_v53 = vmax.f32 %v3089_v27, %v3069_v41  ;;  %v970_v44 = vunpack.c.0.s8 %v3080_v51  ;;  %v971_v4 = vunpack.c.0.s8 %v3084_v22 }
 0x1dc   : > { %4192 = vst [vmem:[#allocation14_spill] sm:$0xff] %v3064_v40  ;;  %v788_v20 = vadd.f32 %v787_v31, %v2616_v19  ;;  %v3098_v17 = vsel %vm2974_vm0, %v3064_v40, -1e+10  ;;  %vm3115_vm9 = vcmp.ne.s32.totalorder %v1151_v56, 0  ;;  %v1152_v38 = vunpack.c.0.s8 %v1105_v9  ;;  %v894_v31 = vld [vmem:[%s2584_s17 + $0x60] sm:$0xff] }
 0x1dd   : > { %v789_v23 = vpop.f32.mrf.mxu1  ;;  %v1350_v48 = vmax.f32 %v3093_v63, %v3098_v17  ;;  %v1153_v42 = vunpack.c.1.s8 %v1105_v9  ;;  %v1106_v2 = vsel %vm3074_vm8, 16843009, %v4193_v6  ;;  %vm3134_vm14 = vnez %v1029_v5 }
 0x1de   : > { %v3107_v61 = vadd.f32 %v789_v23, %v2633_v32  ;;  %v3122_v8 = vsel %vm3019_vm1, %v788_v20, -1e+10  ;;  %vm3138_vm2 = vnez %v1031_v3  ;;  %v1032_v20 = vpack.c.b16 %v969_v39, %v968_v46 }
 0x1df   : > { %v793_v0 = vpop.f32.mrf.mxu1  ;;  %1348 = vmax.xlane.f32.xlu1 %v1347_v53  ;;  %1351 = vmax.xlane.f32.xlu0 %v1350_v48  ;;  %v972_v10 = vunpack.c.1.s8 %v3080_v51  ;;  %v1154_v5 = vunpack.c.0.s8 %v1106_v2  ;;  %v1155_v28 = vunpack.c.1.s8 %v1106_v2  ;;  %v974_v15 = vunpack.c.2.s8 %v3080_v51 }
 0x1e0   : > { %4196 = vst [vmem:[#allocation15_spill] sm:$0xff] %v3107_v61  ;;  %v794_v23 = vadd.f32 %v793_v0, %v2616_v19  ;;  %v3127_v53 = vsel %vm3023_vm3, %v3107_v61, -1e+10  ;;  %v1034_v0 = vpack.c.b16 %v971_v4, %v970_v44  ;;  %v973_v61 = vunpack.c.1.s8 %v3084_v22 }
 0x1e1   : > { %v795_v56 = vpop.f32.mrf.mxu1  ;;  %v1353_v48 = vmax.f32 %v3122_v8, %v3127_v53  ;;  %v975_v3 = vunpack.c.2.s8 %v3084_v22  ;;  %v1107_v4 = vsel %vm3134_vm14, 16843009, %v4193_v6  ;;  %vm3164_vm11 = vcmp.ne.s32.totalorder %v1152_v38, 0 }
 0x1e2   : > { %v3143_v18 = vadd.f32 %v795_v56, %v2633_v32  ;;  %v3152_v39 = vsel %vm3111_vm10, %v794_v23, -1e+10  ;;  %vm3168_vm12 = vcmp.ne.s32.totalorder %v1153_v42, 0  ;;  %v1108_v40 = vsel %vm3138_vm2, 16843009, %v4193_v6 }
 0x1e3   : > { %v797_v30 = vpop.f32.mrf.mxu1  ;;  %1354 = vmax.xlane.f32.xlu1 %v1353_v48  ;;  %v1033_v9 = vpack.c.b8 %v1032_v20, %v1032_v20  ;;  %v1036_v37 = vpack.c.b16 %v973_v61, %v972_v10  ;;  %vm3180_vm4 = vcmp.ne.s32.totalorder %v1154_v5, 0  ;;  %vm3184_vm13 = vcmp.ne.s32.totalorder %v1155_v28, 0 }
 0x1e4   : > { %4205 = vst [vmem:[#allocation16_spill] sm:$0xff] %v3143_v18  ;;  %v798_v46 = vadd.f32 %v797_v30, %v2616_v19  ;;  %v3157_v44 = vsel %vm3115_vm9, %v3143_v18, -1e+10  ;;  %v1035_v18 = vpack.c.b8 %v1034_v0, %v1034_v0  ;;  %v1156_v29 = vunpack.c.0.s8 %v1107_v4 }
 0x1e5   : > { %v799_v2 = vpop.f32.mrf.mxu1  ;;  %v1356_v56 = vmax.f32 %v3152_v39, %v3157_v44  ;;  %v1038_v7 = vpack.c.b16 %v975_v3, %v974_v15  ;;  %vm910_vm15 = vnez %v894_v31  ;;  %v1157_v10 = vunpack.c.1.s8 %v1107_v4 }
 0x1e6   : > { %v3177_v23 = vadd.f32 %v799_v2, %v2633_v32  ;;  %v3191_v20 = vsel %vm3164_vm11, %v798_v46, -1e+10  ;;  %v1158_v5 = vunpack.c.0.s8 %v1108_v40  ;;  %vm911_vm0 = vnez %v895_v11 }
 0x1e7   : > { %v803_v38 = vpop.f32.mrf.mxu1  ;;  %1357 = vmax.xlane.f32.xlu0 %v1356_v56  ;;  %vm3203_vm1 = vnez %v1033_v9  ;;  %vm3207_vm3 = vnez %v1035_v18  ;;  %v1037_v2 = vpack.c.b8 %v1036_v37, %v1036_v37  ;;  %v1039_v48 = vpack.c.b8 %v1038_v7, %v1038_v7 }
 0x1e8   : > { %4210 = vst [vmem:[#allocation17_spill] sm:$0xff] %v3177_v23  ;;  %v804_v43 = vadd.f32 %v803_v38, %v2616_v19  ;;  %v3196_v61 = vsel %vm3168_vm12, %v3177_v23, -1e+10  ;;  %v976_v30 = vunpack.c.3.s8 %v3080_v51  ;;  %v977_v4 = vunpack.c.3.s8 %v3084_v22 }
 0x1e9   : > { %v805_v0 = vpop.f32.mrf.mxu1  ;;  %v1359_v28 = vmax.f32 %v3191_v20, %v3196_v61  ;;  %v3214_v11 = vsel %vm910_vm15, 16843009, %v4193_v6  ;;  %v3227_v7 = vsel %vm911_vm0, 16843009, %v4193_v6  ;;  %vm1220_vm5 = vcmp.ne.s32.totalorder %v1156_v29, 0 }
 0x1ea   : > { %v3201_v15 = vadd.f32 %v805_v0, %v2633_v32  ;;  %v3219_v9 = vsel %vm3180_vm4, %v804_v43, -1e+10  ;;  %vm1221_vm6 = vcmp.ne.s32.totalorder %v1157_v10, 0  ;;  %v1159_v18 = vunpack.c.1.s8 %v1108_v40 }
 0x1eb   : > { %v807_v56 = vpop.f32.mrf.mxu1  ;;  %1360 = vmax.xlane.f32.xlu1 %v1359_v28  ;;  %vm3234_vm7 = vcmp.ne.s32.totalorder %v1158_v5, 0  ;;  %v1109_v36 = vsel %vm3203_vm1, 16843009, %v4193_v6  ;;  %v1110_v42 = vsel %vm3207_vm3, 16843009, %v4193_v6  ;;  %vm3244_vm8 = vnez %v1037_v2 }
 0x1ec   : > { %4215 = vst [vmem:[#allocation18_spill] sm:$0xff] %v3201_v15  ;;  %v808_v31 = vadd.f32 %v807_v56, %v2616_v19  ;;  %v3224_v37 = vsel %vm3184_vm13, %v3201_v15, -1e+10  ;;  %v1040_v40 = vpack.c.b16 %v977_v4, %v976_v30  ;;  %v978_v28 = vunpack.c.0.s8 %v3214_v11 }
 0x1ed   : > { %v809_v51 = vpop.f32.mrf.mxu1  ;;  %v1362_v22 = vmax.f32 %v3219_v9, %v3224_v37  ;;  %v979_v10 = vunpack.c.0.s8 %v3227_v7  ;;  %vm1080_vm10 = vnez %v1039_v48  ;;  %vm1223_vm9 = vcmp.ne.s32.totalorder %v1159_v18, 0 }
 0x1ee   : > { %v3232_v38 = vadd.f32 %v809_v51, %v2633_v32  ;;  %v3251_v56 = vsel %vm1220_vm5, %v808_v31, -1e+10  ;;  %v1160_v51 = vunpack.c.0.s8 %v1109_v36  ;;  %v1162_v4 = vunpack.c.0.s8 %v1110_v42 }
 0x1ef   : > { %v813_v0 = vpop.f32.mrf.mxu1  ;;  %1363 = vmax.xlane.f32.xlu0 %v1362_v22  ;;  %4225 = vst [vmem:[#allocation20_spill] sm:$0xff] %v3251_v56  ;;  %v1161_v22 = vunpack.c.1.s8 %v1109_v36  ;;  %v1163_v15 = vunpack.c.1.s8 %v1110_v42  ;;  %v1111_v31 = vsel %vm3244_vm8, 16843009, %v4193_v6  ;;  %v1112_v48 = vsel %vm1080_vm10, 16843009, %v4193_v6 }
 0x1f0   : > { %4220 = vst [vmem:[#allocation19_spill] sm:$0xff] %v3232_v38  ;;  %v814_v5 = vadd.f32 %v813_v0, %v2616_v19  ;;  %v3254_v3 = vsel %vm1221_vm6, %v3232_v38, -1e+10  ;;  %v1041_v38 = vpack.c.b8 %v1040_v40, %v1040_v40  ;;  %v1042_v23 = vpack.c.b16 %v979_v10, %v978_v28 }
 0x1f1   : > { %4226 = vst [vmem:[#allocation21_spill] sm:$0xff] %v3254_v3  ;;  %v815_v46 = vpop.f32.mrf.mxu1  ;;  %v1365_v2 = vmax.f32 %v3251_v56, %v3254_v3  ;;  %v980_v24 = vunpack.c.1.s8 %v3214_v11  ;;  %v981_v29 = vunpack.c.1.s8 %v3227_v7  ;;  %vm1224_vm14 = vcmp.ne.s32.totalorder %v1160_v51, 0 }
 0x1f2   : > { %v3259_v30 = vadd.f32 %v815_v46, %v2633_v32  ;;  %v3269_v36 = vsel %vm3234_vm7, %v814_v5, -1e+10  ;;  %vm1225_vm2 = vcmp.ne.s32.totalorder %v1161_v22, 0  ;;  %vm3280_vm11 = vcmp.ne.s32.totalorder %v1162_v4, 0 }
 0x1f3   : > { %v817_v0 = vpop.f32.mrf.mxu1  ;;  %1366 = vmax.xlane.f32.xlu1 %v1365_v2  ;;  %4228 = vst [vmem:[#allocation23_spill] sm:$0xff] %v3269_v36  ;;  %v1164_v28 = vunpack.c.0.s8 %v1111_v31  ;;  %v1165_v10 = vunpack.c.1.s8 %v1111_v31  ;;  %vm3284_vm12 = vcmp.ne.s32.totalorder %v1163_v15, 0  ;;  %vm3288_vm4 = vnez %v1041_v38 }
 0x1f4   : > { %4227 = vst [vmem:[#allocation22_spill] sm:$0xff] %v3259_v30  ;;  %v818_v18 = vadd.f32 %v817_v0, %v2616_v19  ;;  %v3272_v42 = vsel %vm1223_vm9, %v3259_v30, -1e+10  ;;  %v1166_v30 = vunpack.c.0.s8 %v1112_v48  ;;  %v1043_v22 = vpack.c.b8 %v1042_v23, %v1042_v23 }
 0x1f5   : > { %4229 = vst [vmem:[#allocation24_spill] sm:$0xff] %v3272_v42  ;;  %v819_v46 = vpop.f32.mrf.mxu1  ;;  %v1368_v2 = vmax.f32 %v3269_v36, %v3272_v42  ;;  %v1044_v31 = vpack.c.b16 %v981_v29, %v980_v24  ;;  %v896_v42 = vld [vmem:[%s2584_s17 + $0x70] sm:$0xff]  ;;  %v1167_v3 = vunpack.c.1.s8 %v1112_v48  ;;  %v982_v38 = vunpack.c.2.s8 %v3214_v11 }
 0x1f6   : > { %v3278_v40 = vadd.f32 %v819_v46, %v2633_v32  ;;  %v3293_v4 = vsel %vm1224_vm14, %v818_v18, -1e+10  ;;  %v983_v56 = vunpack.c.2.s8 %v3227_v7  ;;  %vm3307_vm13 = vcmp.ne.s32.totalorder %v1164_v28, 0 }
 0x1f7   : > { %v823_v5 = vpop.f32.mrf.mxu1  ;;  %1369 = vmax.xlane.f32.xlu0 %v1368_v2  ;;  %v897_v2 = vld [vmem:[%s2584_s17 + $0x78] sm:$0xff]  ;;  %vm3311_vm15 = vcmp.ne.s32.totalorder %v1165_v10, 0  ;;  %v1113_v48 = vsel %vm3288_vm4, 16843009, %v4193_v6  ;;  %vm3318_vm0 = vnez %v1043_v22  ;;  %vm912_vm1 = vnez %v896_v42 }
 0x1f8   : > { %4230 = vst [vmem:[#allocation25_spill] sm:$0xff] %v3278_v40  ;;  %v824_v46 = vadd.f32 %v823_v5, %v2616_v19  ;;  %v3296_v1 = vsel %vm1225_vm2, %v3278_v40, -1e+10  ;;  %vm913_vm3 = vnez %v897_v2  ;;  %vm3334_vm5 = vcmp.ne.s32.totalorder %v1166_v30, 0 }
 0x1f9   : > { %v825_v15 = vpop.f32.mrf.mxu1  ;;  %v1371_v36 = vmax.f32 %v3293_v4, %v3296_v1  ;;  %vm3338_vm6 = vcmp.ne.s32.totalorder %v1167_v3, 0  ;;  %v1046_v43 = vpack.c.b16 %v983_v56, %v982_v38  ;;  %v1168_v0 = vunpack.c.0.s8 %v1113_v48 }
 0x1fa   : > { %v3305_v23 = vadd.f32 %v825_v15, %v2633_v32  ;;  %v3325_v10 = vsel %vm3280_vm11, %v824_v46, -1e+10  ;;  %v1045_v15 = vpack.c.b8 %v1044_v31, %v1044_v31  ;;  %v3346_v2 = vsel %vm912_vm1, 16843009, %v4193_v6 }
 0x1fb   : > { %v827_v29 = vpop.f32.mrf.mxu1  ;;  %1372 = vmax.xlane.f32.xlu1 %v1371_v36  ;;  %4244 = vst [vmem:[#allocation27_spill] sm:$0xff] %v3325_v10  ;;  %v3349_v31 = vsel %vm913_vm3, 16843009, %v4193_v6  ;;  %v1169_v30 = vunpack.c.1.s8 %v1113_v48  ;;  %v1114_v3 = vsel %vm3318_vm0, 16843009, %v4193_v6  ;;  %v985_v56 = vunpack.c.3.s8 %v3227_v7 }
 0x1fc   : > { %4237 = vst [vmem:[#allocation26_spill] sm:$0xff] %v3305_v23  ;;  %v828_v28 = vadd.f32 %v827_v29, %v2616_v19  ;;  %v3330_v36 = vsel %vm3284_vm12, %v3305_v23, -1e+10  ;;  %v984_v23 = vunpack.c.3.s8 %v3214_v11  ;;  %vm3366_vm7 = vnez %v1045_v15 }
 0x1fd   : > { %4245 = vst [vmem:[#allocation28_spill] sm:$0xff] %v3330_v36  ;;  %v829_v51 = vpop.f32.mrf.mxu1  ;;  %v1374_v22 = vmax.f32 %v3325_v10, %v3330_v36  ;;  %v1047_v7 = vpack.c.b8 %v1046_v43, %v1046_v43  ;;  %v987_v18 = vunpack.c.0.s8 %v3349_v31  ;;  %vm3377_vm8 = vcmp.ne.s32.totalorder %v1168_v0, 0 }
 0x1fe   : > { %v3343_v46 = vadd.f32 %v829_v51, %v2633_v32  ;;  %v3359_v51 = vsel %vm3307_vm13, %v828_v28, -1e+10  ;;  %vm3381_vm10 = vcmp.ne.s32.totalorder %v1169_v30, 0  ;;  %v1115_v0 = vsel %vm3366_vm7, 16843009, %v4193_v6 }
 0x1ff   : > { %v833_v29 = vpop.f32.mrf.mxu1  ;;  %1375 = vmax.xlane.f32.xlu0 %v1374_v22  ;;  %4251 = vst [vmem:[#allocation30_spill] sm:$0xff] %v3359_v51  ;;  %v986_v22 = vunpack.c.0.s8 %v3346_v2  ;;  %vm1084_vm9 = vnez %v1047_v7  ;;  %v988_v48 = vunpack.c.1.s8 %v3346_v2  ;;  %v989_v10 = vunpack.c.1.s8 %v3349_v31 }
 0x200   : > { %4250 = vst [vmem:[#allocation29_spill] sm:$0xff] %v3343_v46  ;;  %v834_v38 = vadd.f32 %v833_v29, %v2616_v19  ;;  %v3364_v36 = vsel %vm3311_vm15, %v3343_v46, -1e+10  ;;  %v1170_v29 = vunpack.c.0.s8 %v1114_v3  ;;  %v990_v15 = vunpack.c.2.s8 %v3346_v2 }
 0x201   : > { %4252 = vst [vmem:[#allocation31_spill] sm:$0xff] %v3364_v36  ;;  %v835_v5 = vpop.f32.mrf.mxu1  ;;  %v1377_v11 = vmax.f32 %v3359_v51, %v3364_v36  ;;  %v1048_v36 = vpack.c.b16 %v985_v56, %v984_v23  ;;  %v1171_v23 = vunpack.c.1.s8 %v1114_v3  ;;  %v1050_v56 = vpack.c.b16 %v987_v18, %v986_v22 }
 0x202   : > { %v3375_v28 = vadd.f32 %v835_v5, %v2633_v32  ;;  %v3388_v51 = vsel %vm3334_vm5, %v834_v38, -1e+10  ;;  %vm3403_vm14 = vcmp.ne.s32.totalorder %v1170_v29, 0  ;;  %v1116_v22 = vsel %vm1084_vm9, 16843009, %v4193_v6 }
 0x203   : > { %v837_v24 = vpop.f32.mrf.mxu1  ;;  %1378 = vmax.xlane.f32.xlu1 %v1377_v11  ;;  %4260 = vst [vmem:[#allocation33_spill] sm:$0xff] %v3388_v51  ;;  %vm1235_vm2 = vcmp.ne.s32.totalorder %v1171_v23, 0  ;;  %v1173_v29 = vunpack.c.1.s8 %v1115_v0  ;;  %v1174_v46 = vunpack.c.0.s8 %v1116_v22 }
 0x204   : > { %4255 = vst [vmem:[#allocation32_spill] sm:$0xff] %v3375_v28  ;;  %v838_v43 = vadd.f32 %v837_v24, %v2616_v19  ;;  %v3393_v5 = vsel %vm3338_vm6, %v3375_v28, -1e+10  ;;  %v1172_v24 = vunpack.c.0.s8 %v1115_v0  ;;  %v1049_v28 = vpack.c.b8 %v1048_v36, %v1048_v36 }
 0x205   : > { %4261 = vst [vmem:[#allocation34_spill] sm:$0xff] %v3393_v5  ;;  %v839_v30 = vpop.f32.mrf.mxu1  ;;  %v1380_v11 = vmax.f32 %v3388_v51, %v3393_v5  ;;  %vm1237_vm4 = vcmp.ne.s32.totalorder %v1173_v29, 0  ;;  %vm3445_vm15 = vcmp.ne.s32.totalorder %v1174_v46, 0 }
 0x206   : > { %v3401_v40 = vadd.f32 %v839_v30, %v2633_v32  ;;  %v3412_v3 = vsel %vm3377_vm8, %v838_v43, -1e+10  ;;  %v1051_v30 = vpack.c.b8 %v1050_v56, %v1050_v56  ;;  %v991_v43 = vunpack.c.2.s8 %v3349_v31 }
 0x207   : > { %v843_v42 = vpop.f32.mrf.mxu1  ;;  %1381 = vmax.xlane.f32.xlu0 %v1380_v11  ;;  %vm1085_vm11 = vnez %v1049_v28  ;;  %vm3435_vm12 = vcmp.ne.s32.totalorder %v1172_v24, 0  ;;  %v1175_v28 = vunpack.c.1.s8 %v1116_v22 }
 0x208   : > { %4262 = vst [vmem:[#allocation35_spill] sm:$0xff] %v3401_v40  ;;  %v844_v5 = vadd.f32 %v843_v42, %v2616_v19  ;;  %v3417_v7 = vsel %vm3381_vm10, %v3401_v40, -1e+10  ;;  %v1052_v40 = vpack.c.b16 %v989_v10, %v988_v48  ;;  %vm1086_vm13 = vnez %v1051_v30 }
 0x209   : > { %4265 = vst [vmem:[#allocation36_spill] sm:$0xff] %v3417_v7  ;;  %v845_v18 = vpop.f32.mrf.mxu1  ;;  %v1383_v36 = vmax.f32 %v3412_v3, %v3417_v7  ;;  %v1054_v38 = vpack.c.b16 %v991_v43, %v990_v15  ;;  %v1118_v15 = vsel %vm1086_vm13, 16843009, %v4193_v6  ;;  %vm1239_vm0 = vcmp.ne.s32.totalorder %v1175_v28, 0 }
 0x20a   : > { %v3423_v11 = vadd.f32 %v845_v18, %v2633_v32  ;;  %v3430_v7 = vsel %vm3403_vm14, %v844_v5, -1e+10  ;;  %v1117_v5 = vsel %vm1085_vm11, 16843009, %v4193_v6  ;;  %v1179_v28 = vunpack.c.1.s8 %v1118_v15 }
 0x20b   : > { %v847_v42 = vpop.f32.mrf.mxu1  ;;  %1384 = vmax.xlane.f32.xlu1 %v1383_v36  ;;  %v1053_v36 = vpack.c.b8 %v1052_v40, %v1052_v40  ;;  %v1176_v40 = vunpack.c.0.s8 %v1117_v5 }
 0x20c   : > { %4266 = vst [vmem:[#allocation37_spill] sm:$0xff] %v3423_v11  ;;  %v848_v51 = vadd.f32 %v847_v42, %v2616_v19  ;;  %v3433_v0 = vsel %vm1235_vm2, %v3423_v11, -1e+10  ;;  %v992_v42 = vunpack.c.3.s8 %v3346_v2  ;;  %v993_v11 = vunpack.c.3.s8 %v3349_v31 }
 0x20d   : > { %v849_v56 = vpop.f32.mrf.mxu1  ;;  %v1386_v18 = vmax.f32 %v3430_v7, %v3433_v0  ;;  %v1177_v2 = vunpack.c.1.s8 %v1117_v5  ;;  %vm1087_vm1 = vnez %v1053_v36  ;;  %vm1240_vm3 = vcmp.ne.s32.totalorder %v1176_v40, 0 }
 0x20e   : > { %v3442_v10 = vadd.f32 %v849_v56, %v2633_v32  ;;  %v3454_v29 = vsel %vm3435_vm12, %v848_v51, -1e+10  ;;  %v1055_v56 = vpack.c.b8 %v1054_v38, %v1054_v38  ;;  %v1178_v51 = vunpack.c.0.s8 %v1118_v15 }
 0x20f   : > { %v853_v48 = vpop.f32.mrf.mxu1  ;;  %1387 = vmax.xlane.f32.xlu0 %v1386_v18  ;;  %v1056_v23 = vpack.c.b16 %v993_v11, %v992_v42  ;;  %vm1241_vm5 = vcmp.ne.s32.totalorder %v1177_v2, 0  ;;  %v1119_v11 = vsel %vm1087_vm1, 16843009, %v4193_v6  ;;  %vm1243_vm8 = vcmp.ne.s32.totalorder %v1179_v28, 0 }
 0x210   : > { %4269 = vst [vmem:[#allocation38_spill] sm:$0xff] %v3442_v10  ;;  %v854_v22 = vadd.f32 %v853_v48, %v2616_v19  ;;  %v3457_v30 = vsel %vm1237_vm4, %v3442_v10, -1e+10  ;;  %vm1088_vm6 = vnez %v1055_v56  ;;  %vm3479_vm7 = vcmp.ne.s32.totalorder %v1178_v51, 0 }
 0x211   : > { %4272 = vst [vmem:[#allocation39_spill] sm:$0xff] %v3457_v30  ;;  %v855_v43 = vpop.f32.mrf.mxu1  ;;  %v1389_v46 = vmax.f32 %v3454_v29, %v3457_v30  ;;  %v1057_v42 = vpack.c.b8 %v1056_v23, %v1056_v23  ;;  %v1180_v56 = vunpack.c.0.s8 %v1119_v11  ;;  %v1120_v51 = vsel %vm1088_vm6, 16843009, %v4193_v6 }
 0x212   : > { %v3463_v31 = vadd.f32 %v855_v43, %v2633_v32  ;;  %v3468_v10 = vsel %vm3445_vm15, %v854_v22, -1e+10 }
 0x213   : > { %v857_v18 = vpop.f32.mrf.mxu1  ;;  %1390 = vmax.xlane.f32.xlu1 %v1389_v46  ;;  %vm1089_vm10 = vnez %v1057_v42  ;;  %vm1244_vm9 = vcmp.ne.s32.totalorder %v1180_v56, 0 }
 0x214   : > { %4273 = vst [vmem:[#allocation40_spill] sm:$0xff] %v3463_v31  ;;  %v858_v48 = vadd.f32 %v857_v18, %v2616_v19  ;;  %v3471_v30 = vsel %vm1239_vm0, %v3463_v31, -1e+10  ;;  %v1181_v18 = vunpack.c.1.s8 %v1119_v11  ;;  %v1121_v42 = vsel %vm1089_vm10, 16843009, %v4193_v6 }
 0x215   : > { %v859_v5 = vpop.f32.mrf.mxu1  ;;  %v1392_v43 = vmax.f32 %v3468_v10, %v3471_v30 }
 0x216   : > { %v3476_v38 = vadd.f32 %v859_v5, %v2633_v32  ;;  %v3484_v15 = vsel %vm1240_vm3, %v858_v48, -1e+10  ;;  %vm1245_vm14 = vcmp.ne.s32.totalorder %v1181_v18, 0  ;;  %v1184_v18 = vunpack.c.0.s8 %v1121_v42 }
 0x217   : > { %v863_v36 = vpop.f32.mrf.mxu1  ;;  %1393 = vmax.xlane.f32.xlu0 %v1392_v43 }
 0x218   : > { %4274 = vst [vmem:[#allocation41_spill] sm:$0xff] %v3476_v38  ;;  %v864_v22 = vadd.f32 %v863_v36, %v2616_v19  ;;  %v3487_v46 = vsel %vm1241_vm5, %v3476_v38, -1e+10  ;;  %v1182_v36 = vunpack.c.0.s8 %v1120_v51  ;;  %vm1248_vm12 = vcmp.ne.s32.totalorder %v1184_v18, 0 }
 0x219   : > { %v865_v40 = vpop.f32.mrf.mxu1  ;;  %v1395_v2 = vmax.f32 %v3484_v15, %v3487_v46 }
 0x21a   : > { %v3493_v5 = vadd.f32 %v865_v40, %v2633_v32  ;;  %v3498_v43 = vsel %vm3479_vm7, %v864_v22, -1e+10  ;;  %v1183_v40 = vunpack.c.1.s8 %v1120_v51  ;;  %vm1246_vm2 = vcmp.ne.s32.totalorder %v1182_v36, 0 }
 0x21b   : > { %v867_v23 = vpop.f32.mrf.mxu1  ;;  %1396 = vmax.xlane.f32.xlu1 %v1395_v2 }
 0x21c   : > { %4277 = vst [vmem:[#allocation42_spill] sm:$0xff] %v3493_v5  ;;  %v868_v48 = vadd.f32 %v867_v23, %v2616_v19  ;;  %v3501_v28 = vsel %vm1243_vm8, %v3493_v5, -1e+10  ;;  %vm1247_vm11 = vcmp.ne.s32.totalorder %v1183_v40, 0 }
 0x21d   : > { %v869_v38 = vpop.f32.mrf.mxu1  ;;  %v1398_v11 = vmax.f32 %v3498_v43, %v3501_v28 }
 0x21e   : > { %v3506_v2 = vadd.f32 %v869_v38, %v2633_v32  ;;  %v3510_v22 = vsel %vm1244_vm9, %v868_v48, -1e+10  ;;  %v1185_v38 = vunpack.c.1.s8 %v1121_v42 }
 0x21f   : > { %v873_v23 = vpop.f32.mrf.mxu1  ;;  %1399 = vmax.xlane.f32.xlu0 %v1398_v11 }
 0x220   : > { %4278 = vst [vmem:[#allocation43_spill] sm:$0xff] %v3506_v2  ;;  %v874_v24 = vadd.f32 %v873_v23, %v2616_v19  ;;  %v3513_v5 = vsel %vm1245_vm14, %v3506_v2, -1e+10  ;;  %vm1249_vm4 = vcmp.ne.s32.totalorder %v1185_v38, 0 }
 0x221   : > { %v875_v31 = vpop.f32.mrf.mxu1  ;;  %v1401_v56 = vmax.f32 %v3510_v22, %v3513_v5 }
 0x222   : > { %v3518_v51 = vadd.f32 %v875_v31, %v2633_v32  ;;  %v3521_v48 = vsel %vm1246_vm2, %v874_v24, -1e+10 }
 0x223   : > { %v877_v6 = vpop.f32.mrf.mxu1  ;;  %1402 = vmax.xlane.f32.xlu1 %v1401_v56 }
 0x224   : > { %4279 = vst [vmem:[#allocation44_spill] sm:$0xff] %v3518_v51  ;;  %v878_v11 = vadd.f32 %v877_v6, %v2616_v19  ;;  %v3524_v23 = vsel %vm1247_vm11, %v3518_v51, -1e+10 }
 0x225   : > { %v879_v36 = vpop.f32.mrf.mxu1  ;;  %v1404_v2 = vmax.f32 %v3521_v48, %v3524_v23 }
 0x226   : > { %v3529_v40 = vadd.f32 %v879_v36, %v2633_v32  ;;  %v3531_v31 = vsel %vm1248_vm12, %v878_v11, -1e+10 }
 0x227   : > { %1405 = vmax.xlane.f32.xlu0 %v1404_v2 }
 0x228   : > { %4280 = vst [vmem:[#allocation45_spill] sm:$0xff] %v3529_v40  ;;  %v3534_v42 = vsel %vm1249_vm4, %v3529_v40, -1e+10 }
 0x229   : > { %4281 = vst [vmem:[#allocation46_spill] sm:$0xff] %v3534_v42  ;;  %v1407_v19 = vmax.f32 %v3531_v31, %v3534_v42 }
 0x22b   : > { %1408 = vmax.xlane.f32.xlu1 %v1407_v19 }
 0x248   : > { %v1316_v24 = vpop.xlane.xlu0 %1315 }
 0x249   : > { %v1410_v56 = vsub.f32 %v2711_v13, %v1316_v24  ;;  %v1411_v6 = vsub.f32 %v2716_v14, %v1316_v24 }
 0x24b   : > { %v1474_v18 = vmul.f32 1.442695, %v1410_v56  ;;  %v1476_v38 = vmul.f32 1.442695, %v1411_v6 }
 0x24c   : > { %v1319_v51 = vpop.xlane.xlu0 %1318 }
 0x24d   : > { %2168 = vpow2.f32 %v1474_v18  ;;  %v1412_v32 = vsub.f32 %v2752_v33, %v1319_v51  ;;  %v1413_v2 = vsub.f32 %v2757_v34, %v1319_v51 }
 0x24e   : > { %2170 = vpow2.f32 %v1476_v38 }
 0x24f   : > { %v1478_v11 = vmul.f32 1.442695, %v1412_v32  ;;  %v1480_v36 = vmul.f32 1.442695, %v1413_v2 }
 0x250   : > { %v1322_v40 = vpop.xlane.xlu1 %1321 }
 0x251   : > { %2172 = vpow2.f32 %v1478_v11  ;;  %v1414_v19 = vsub.f32 %v2793_v59, %v1322_v40  ;;  %v1415_v42 = vsub.f32 %v2798_v60, %v1322_v40 }
 0x252   : > { %2174 = vpow2.f32 %v1480_v36 }
 0x253   : > { %v1482_v13 = vmul.f32 1.442695, %v1414_v19  ;;  %v1484_v14 = vmul.f32 1.442695, %v1415_v42 }
 0x254   : > { %v1325_v24 = vpop.xlane.xlu1 %1324 }
 0x255   : > { %2176 = vpow2.f32 %v1482_v13  ;;  %v1416_v56 = vsub.f32 %v2840_v25, %v1325_v24  ;;  %v1417_v33 = vsub.f32 %v2845_v52, %v1325_v24 }
 0x256   : > { %2178 = vpow2.f32 %v1484_v14 }
 0x257   : > { %v1486_v34 = vmul.f32 1.442695, %v1416_v56  ;;  %v1488_v51 = vmul.f32 1.442695, %v1417_v33 }
 0x258   : > { %v1328_v6 = vpop.xlane.xlu0 %1327 }
 0x259   : > { %2180 = vpow2.f32 %v1486_v34  ;;  %v1418_v18 = vsub.f32 %v2899_v58, %v1328_v6  ;;  %v1419_v59 = vsub.f32 %v2904_v62, %v1328_v6 }
 0x25a   : > { %v3548_v38 = vpop.eup %2168  ;;  %2182 = vpow2.f32 %v1488_v51 }
 0x25b   : > { %v3550_v60 = vpop.eup %2170  ;;  %v1490_v40 = vmul.f32 1.442695, %v1418_v18  ;;  %v1492_v42 = vmul.f32 1.442695, %v1419_v59 }
 0x25c   : > { %v1331_v32 = vpop.xlane.xlu1 %1330  ;;  %v1340_v25 = vpop.xlane.xlu0 %1339  ;;  %v1602_v52 = vadd.f32 %v3550_v60, %v3548_v38 }
 0x25d   : > { %2184 = vpow2.f32 %v1490_v40  ;;  %v1420_v2 = vsub.f32 %v2955_v54, %v1331_v32  ;;  %v1421_v11 = vsub.f32 %v2960_v55, %v1331_v32  ;;  %v1426_v58 = vsub.f32 %v2938_v21, %v1340_v25 }
 0x25e   : > { %v3557_v62 = vpop.eup %2172  ;;  %2186 = vpow2.f32 %v1492_v42  ;;  %v1427_v36 = vsub.f32 %v2933_v12, %v1340_v25  ;;  %1603 = vadd.xlane.f32.xlu0 %v1602_v52 }
 0x25f   : > { %v3560_v19 = vpop.eup %2174  ;;  %v1494_v13 = vmul.f32 1.442695, %v1420_v2  ;;  %v1496_v14 = vmul.f32 1.442695, %v1421_v11  ;;  %v1506_v24 = vmul.f32 1.442695, %v1426_v58 }
 0x260   : > { %v1508_v56 = vmul.f32 1.442695, %v1427_v36  ;;  %v1343_v33 = vpop.xlane.xlu1 %1342  ;;  %v1334_v34 = vpop.xlane.xlu0 %1333  ;;  %v1605_v54 = vadd.f32 %v3560_v19, %v3557_v62 }
 0x261   : > { %2188 = vpow2.f32 %v1494_v13  ;;  %v1428_v21 = vsub.f32 %v3004_v16, %v1343_v33  ;;  %v1429_v55 = vsub.f32 %v2988_v57, %v1343_v33  ;;  %v1422_v51 = vsub.f32 %v3008_v35, %v1334_v34 }
 0x262   : > { %v3567_v12 = vpop.eup %2176  ;;  %2190 = vpow2.f32 %v1496_v14  ;;  %v1423_v6 = vsub.f32 %v3013_v26, %v1334_v34  ;;  %1606 = vadd.xlane.f32.xlu1 %v1605_v54 }
 0x263   : > { %v3570_v18 = vpop.eup %2178  ;;  %2192 = vpow2.f32 %v1506_v24  ;;  %v1510_v59 = vmul.f32 1.442695, %v1428_v21  ;;  %v1512_v40 = vmul.f32 1.442695, %v1429_v55  ;;  %v1498_v42 = vmul.f32 1.442695, %v1422_v51 }
 0x264   : > { %2194 = vpow2.f32 %v1508_v56  ;;  %v1500_v32 = vmul.f32 1.442695, %v1423_v6  ;;  %v1337_v25 = vpop.xlane.xlu1 %1336  ;;  %v1346_v16 = vpop.xlane.xlu0 %1345  ;;  %v1608_v57 = vadd.f32 %v3570_v18, %v3567_v12 }
 0x265   : > { %2196 = vpow2.f32 %v1510_v59  ;;  %v1424_v35 = vsub.f32 %v3050_v47, %v1337_v25  ;;  %v1425_v52 = vsub.f32 %v3055_v45, %v1337_v25  ;;  %v1430_v26 = vsub.f32 %v3044_v49, %v1346_v16 }
 0x266   : > { %v3577_v2 = vpop.eup %2180  ;;  %2198 = vpow2.f32 %v1512_v40  ;;  %v1431_v11 = vsub.f32 %v3040_v50, %v1346_v16  ;;  %1609 = vadd.xlane.f32.xlu0 %v1608_v57 }
 0x267   : > { %v3580_v58 = vpop.eup %2182  ;;  %2200 = vpow2.f32 %v1498_v42  ;;  %v1502_v36 = vmul.f32 1.442695, %v1424_v35  ;;  %v1504_v13 = vmul.f32 1.442695, %v1425_v52  ;;  %v1514_v14 = vmul.f32 1.442695, %v1430_v26 }
 0x268   : > { %2202 = vpow2.f32 %v1500_v32  ;;  %v1516_v24 = vmul.f32 1.442695, %v1431_v11  ;;  %v1349_v56 = vpop.xlane.xlu1 %1348  ;;  %v1352_v47 = vpop.xlane.xlu0 %1351  ;;  %v1611_v45 = vadd.f32 %v3580_v58, %v3577_v2 }
 0x269   : > { %2204 = vpow2.f32 %v1502_v36  ;;  %v1432_v49 = vsub.f32 %v3089_v27, %v1349_v56  ;;  %v1433_v33 = vsub.f32 %v3069_v41, %v1349_v56  ;;  %v1434_v50 = vsub.f32 %v3093_v63, %v1352_v47 }
 0x26a   : > { %v3587_v34 = vpop.eup %2184  ;;  %2206 = vpow2.f32 %v1504_v13  ;;  %v1435_v54 = vsub.f32 %v3098_v17, %v1352_v47  ;;  %1612 = vadd.xlane.f32.xlu1 %v1611_v45 }
 0x26b   : > { %v3590_v21 = vpop.eup %2186  ;;  %2208 = vpow2.f32 %v1514_v14  ;;  %v1518_v55 = vmul.f32 1.442695, %v1432_v49  ;;  %v1520_v51 = vmul.f32 1.442695, %v1433_v33  ;;  %v1522_v6 = vmul.f32 1.442695, %v1434_v50 }
 0x26c   : > { %2210 = vpow2.f32 %v1516_v24  ;;  %v1524_v59 = vmul.f32 1.442695, %v1435_v54  ;;  %v1355_v40 = vpop.xlane.xlu1 %1354  ;;  %v1614_v41 = vadd.f32 %v3590_v21, %v3587_v34 }
 0x26d   : > { %2212 = vpow2.f32 %v1518_v55  ;;  %v1436_v27 = vsub.f32 %v3122_v8, %v1355_v40  ;;  %v1437_v63 = vsub.f32 %v3127_v53, %v1355_v40 }
 0x26e   : > { %v3596_v42 = vpop.eup %2188  ;;  %2214 = vpow2.f32 %v1520_v51  ;;  %1615 = vadd.xlane.f32.xlu0 %v1614_v41 }
 0x26f   : > { %v3598_v17 = vpop.eup %2190  ;;  %2216 = vpow2.f32 %v1522_v6  ;;  %v1526_v32 = vmul.f32 1.442695, %v1436_v27  ;;  %v1528_v25 = vmul.f32 1.442695, %v1437_v63 }
 0x270   : > { %v3600_v16 = vpop.eup %2192  ;;  %2218 = vpow2.f32 %v1524_v59  ;;  %v1358_v57 = vpop.xlane.xlu0 %1357  ;;  %v1617_v35 = vadd.f32 %v3598_v17, %v3596_v42 }
 0x271   : > { %v3604_v52 = vpop.eup %2194  ;;  %2220 = vpow2.f32 %v1526_v32  ;;  %v1438_v8 = vsub.f32 %v3152_v39, %v1358_v57  ;;  %v1439_v53 = vsub.f32 %v3157_v44, %v1358_v57 }
 0x272   : > { %v3608_v26 = vpop.eup %2196  ;;  %2222 = vpow2.f32 %v1528_v25  ;;  %1618 = vadd.xlane.f32.xlu1 %v1617_v35  ;;  %v1626_v11 = vadd.f32 %v3604_v52, %v3600_v16 }
 0x273   : > { %v3612_v36 = vpop.eup %2198  ;;  %v1530_v13 = vmul.f32 1.442695, %v1438_v8  ;;  %v1532_v14 = vmul.f32 1.442695, %v1439_v53 }
 0x274   : > { %v3614_v24 = vpop.eup %2200  ;;  %1627 = vadd.xlane.f32.xlu0 %v1626_v11  ;;  %v1361_v56 = vpop.xlane.xlu1 %1360  ;;  %v1629_v39 = vadd.f32 %v3612_v36, %v3608_v26  ;;  %v4283_v11 = vld [vmem:[#allocation21_spill] sm:$0xff] }
 0x275   : > { %v3618_v47 = vpop.eup %2202  ;;  %2224 = vpow2.f32 %v1530_v13  ;;  %v1440_v44 = vsub.f32 %v3191_v20, %v1361_v56  ;;  %v1441_v45 = vsub.f32 %v3196_v61, %v1361_v56 }
 0x276   : > { %v3622_v49 = vpop.eup %2204  ;;  %2226 = vpow2.f32 %v1532_v14  ;;  %1630 = vadd.xlane.f32.xlu1 %v1629_v39  ;;  %v1620_v33 = vadd.f32 %v3618_v47, %v3614_v24 }
 0x277   : > { %v3626_v50 = vpop.eup %2206  ;;  %v1534_v54 = vmul.f32 1.442695, %v1440_v44  ;;  %v1536_v55 = vmul.f32 1.442695, %v1441_v45 }
 0x278   : > { %v3628_v51 = vpop.eup %2208  ;;  %1621 = vadd.xlane.f32.xlu0 %v1620_v33  ;;  %v1364_v6 = vpop.xlane.xlu0 %1363  ;;  %v1623_v20 = vadd.f32 %v3626_v50, %v3622_v49 }
 0x279   : > { %v3632_v59 = vpop.eup %2210  ;;  %2228 = vpow2.f32 %v1534_v54  ;;  %v1442_v61 = vsub.f32 %v3219_v9, %v1364_v6  ;;  %v1443_v40 = vsub.f32 %v3224_v37, %v1364_v6  ;;  %v4282_v37 = vld [vmem:[#allocation20_spill] sm:$0xff] }
 0x27a   : > { %v3636_v41 = vpop.eup %2212  ;;  %2230 = vpow2.f32 %v1536_v55  ;;  %1624 = vadd.xlane.f32.xlu1 %v1623_v20  ;;  %v1632_v27 = vadd.f32 %v3632_v59, %v3628_v51  ;;  %v4284_v55 = vld [vmem:[#allocation23_spill] sm:$0xff]  ;;  %v4285_v20 = vld [vmem:[#allocation24_spill] sm:$0xff] }
 0x27b   : > { %v3640_v63 = vpop.eup %2214  ;;  %v1538_v32 = vmul.f32 1.442695, %v1442_v61  ;;  %v1540_v25 = vmul.f32 1.442695, %v1443_v40 }
 0x27c   : > { %v3642_v57 = vpop.eup %2216  ;;  %1633 = vadd.xlane.f32.xlu0 %v1632_v27  ;;  %v1367_v35 = vpop.xlane.xlu1 %1366  ;;  %v1635_v9 = vadd.f32 %v3640_v63, %v3636_v41 }
 0x27d   : > { %v3646_v8 = vpop.eup %2218  ;;  %2232 = vpow2.f32 %v1538_v32  ;;  %v1444_v53 = vsub.f32 %v4282_v37, %v1367_v35  ;;  %v1445_v13 = vsub.f32 %v4283_v11, %v1367_v35 }
 0x27e   : > { %v3650_v14 = vpop.eup %2220  ;;  %2234 = vpow2.f32 %v1540_v25  ;;  %1636 = vadd.xlane.f32.xlu1 %v1635_v9  ;;  %v1638_v56 = vadd.f32 %v3646_v8, %v3642_v57 }
 0x27f   : > { %v3654_v39 = vpop.eup %2222  ;;  %v1542_v44 = vmul.f32 1.442695, %v1444_v53  ;;  %v1544_v45 = vmul.f32 1.442695, %v1445_v13 }
 0x280   : > { %1639 = vadd.xlane.f32.xlu0 %v1638_v56  ;;  %v1370_v33 = vpop.xlane.xlu0 %1369  ;;  %v1641_v54 = vadd.f32 %v3654_v39, %v3650_v14 }
 0x281   : > { %2236 = vpow2.f32 %v1542_v44  ;;  %v1446_v6 = vsub.f32 %v4284_v55, %v1370_v33  ;;  %v1447_v61 = vsub.f32 %v4285_v20, %v1370_v33 }
 0x282   : > { %v3660_v40 = vpop.eup %2224  ;;  %2238 = vpow2.f32 %v1544_v45  ;;  %1642 = vadd.xlane.f32.xlu1 %v1641_v54  ;;  %v4286_v54 = vld [vmem:[#allocation27_spill] sm:$0xff] }
 0x283   : > { %v3662_v27 = vpop.eup %2226  ;;  %v1546_v32 = vmul.f32 1.442695, %v1446_v6  ;;  %v1548_v25 = vmul.f32 1.442695, %v1447_v61  ;;  %v4287_v6 = vld [vmem:[#allocation28_spill] sm:$0xff] }
 0x284   : > { %v1373_v35 = vpop.xlane.xlu1 %1372  ;;  %v1644_v9 = vadd.f32 %v3662_v27, %v3660_v40 }
 0x285   : > { %2240 = vpow2.f32 %v1546_v32  ;;  %v1448_v37 = vsub.f32 %v3293_v4, %v1373_v35  ;;  %v1449_v53 = vsub.f32 %v3296_v1, %v1373_v35 }
 0x286   : > { %v3668_v11 = vpop.eup %2228  ;;  %2242 = vpow2.f32 %v1548_v25  ;;  %1645 = vadd.xlane.f32.xlu0 %v1644_v9  ;;  %v4290_v9 = vld [vmem:[#allocation30_spill] sm:$0xff] }
 0x287   : > { %v3670_v13 = vpop.eup %2230  ;;  %v1550_v56 = vmul.f32 1.442695, %v1448_v37  ;;  %v1552_v44 = vmul.f32 1.442695, %v1449_v53  ;;  %v4291_v53 = vld [vmem:[#allocation31_spill] sm:$0xff] }
 0x288   : > { %v1376_v45 = vpop.xlane.xlu0 %1375  ;;  %v1647_v33 = vadd.f32 %v3670_v13, %v3668_v11 }
 0x289   : > { %2244 = vpow2.f32 %v1550_v56  ;;  %v1450_v55 = vsub.f32 %v4286_v54, %v1376_v45  ;;  %v1451_v20 = vsub.f32 %v4287_v6, %v1376_v45 }
 0x28a   : > { %v3676_v4 = vpop.eup %2232  ;;  %2246 = vpow2.f32 %v1552_v44  ;;  %1648 = vadd.xlane.f32.xlu1 %v1647_v33 }
 0x28b   : > { %4288 = vst [vmem:[#allocation20_spill] sm:$0xff] %v3676_v4  ;;  %v3678_v1 = vpop.eup %2234  ;;  %v1554_v61 = vmul.f32 1.442695, %v1450_v55  ;;  %v1556_v32 = vmul.f32 1.442695, %v1451_v20  ;;  %v4293_v20 = vld [vmem:[#allocation33_spill] sm:$0xff] }
 0x28c   : > { %4289 = vst [vmem:[#allocation21_spill] sm:$0xff] %v3678_v1  ;;  %v1379_v25 = vpop.xlane.xlu1 %1378  ;;  %v1650_v35 = vadd.f32 %v3678_v1, %v3676_v4 }
 0x28d   : > { %2248 = vpow2.f32 %v1554_v61  ;;  %v1452_v37 = vsub.f32 %v4290_v9, %v1379_v25  ;;  %v1453_v56 = vsub.f32 %v4291_v53, %v1379_v25  ;;  %v4294_v61 = vld [vmem:[#allocation34_spill] sm:$0xff] }
 0x28e   : > { %v3684_v54 = vpop.eup %2236  ;;  %2250 = vpow2.f32 %v1556_v32  ;;  %1651 = vadd.xlane.f32.xlu0 %v1650_v35 }
 0x28f   : > { %v3686_v45 = vpop.eup %2238  ;;  %v1558_v44 = vmul.f32 1.442695, %v1452_v37  ;;  %v1560_v33 = vmul.f32 1.442695, %v1453_v56 }
 0x290   : > { %4292 = vst [vmem:[#allocation23_spill] sm:$0xff] %v3686_v45  ;;  %v1382_v6 = vpop.xlane.xlu0 %1381  ;;  %v1653_v55 = vadd.f32 %v3686_v45, %v3684_v54 }
 0x291   : > { %2252 = vpow2.f32 %v1558_v44  ;;  %v1454_v1 = vsub.f32 %v4293_v20, %v1382_v6  ;;  %v1455_v4 = vsub.f32 %v4294_v61, %v1382_v6  ;;  %v4295_v44 = vld [vmem:[#allocation36_spill] sm:$0xff] }
 0x292   : > { %v3692_v9 = vpop.eup %2240  ;;  %2254 = vpow2.f32 %v1560_v33  ;;  %1654 = vadd.xlane.f32.xlu1 %v1653_v55 }
 0x293   : > { %v3694_v25 = vpop.eup %2242  ;;  %v1562_v32 = vmul.f32 1.442695, %v1454_v1  ;;  %v1564_v35 = vmul.f32 1.442695, %v1455_v4 }
 0x294   : > { %v1385_v53 = vpop.xlane.xlu1 %1384  ;;  %v1656_v37 = vadd.f32 %v3694_v25, %v3692_v9 }
 0x295   : > { %2256 = vpow2.f32 %v1562_v32  ;;  %v1456_v56 = vsub.f32 %v3412_v3, %v1385_v53  ;;  %v1457_v45 = vsub.f32 %v4295_v44, %v1385_v53 }
 0x296   : > { %v3700_v20 = vpop.eup %2244  ;;  %2258 = vpow2.f32 %v1564_v35  ;;  %1657 = vadd.xlane.f32.xlu0 %v1656_v37 }
 0x297   : > { %v3702_v6 = vpop.eup %2246  ;;  %v1566_v33 = vmul.f32 1.442695, %v1456_v56  ;;  %v1568_v55 = vmul.f32 1.442695, %v1457_v45 }
 0x298   : > { %4296 = vst [vmem:[#allocation24_spill] sm:$0xff] %v3702_v6  ;;  %v1388_v61 = vpop.xlane.xlu0 %1387  ;;  %v1659_v4 = vadd.f32 %v3702_v6, %v3700_v20 }
 0x299   : > { %2260 = vpow2.f32 %v1566_v33  ;;  %v1458_v1 = vsub.f32 %v3430_v7, %v1388_v61  ;;  %v1459_v32 = vsub.f32 %v3433_v0, %v1388_v61  ;;  %v4297_v33 = vld [vmem:[#allocation39_spill] sm:$0xff] }
 0x29a   : > { %v3708_v3 = vpop.eup %2248  ;;  %2262 = vpow2.f32 %v1568_v55  ;;  %1660 = vadd.xlane.f32.xlu1 %v1659_v4 }
 0x29b   : > { %v3710_v53 = vpop.eup %2250  ;;  %v1570_v35 = vmul.f32 1.442695, %v1458_v1  ;;  %v1572_v37 = vmul.f32 1.442695, %v1459_v32 }
 0x29c   : > { %v1391_v44 = vpop.xlane.xlu1 %1390  ;;  %v1662_v45 = vadd.f32 %v3710_v53, %v3708_v3 }
 0x29d   : > { %2264 = vpow2.f32 %v1570_v35  ;;  %v1460_v56 = vsub.f32 %v3454_v29, %v1391_v44  ;;  %v1461_v6 = vsub.f32 %v4297_v33, %v1391_v44 }
 0x29e   : > { %v3716_v7 = vpop.eup %2252  ;;  %2266 = vpow2.f32 %v1572_v37  ;;  %1663 = vadd.xlane.f32.xlu0 %v1662_v45 }
 0x29f   : > { %v3718_v0 = vpop.eup %2254  ;;  %v1574_v55 = vmul.f32 1.442695, %v1460_v56  ;;  %v1576_v61 = vmul.f32 1.442695, %v1461_v6 }
 0x2a0   : > { %v1394_v4 = vpop.xlane.xlu0 %1393  ;;  %v1665_v1 = vadd.f32 %v3718_v0, %v3716_v7 }
 0x2a1   : > { %2268 = vpow2.f32 %v1574_v55  ;;  %v1462_v32 = vsub.f32 %v3468_v10, %v1394_v4  ;;  %v1463_v35 = vsub.f32 %v3471_v30, %v1394_v4 }
 0x2a2   : > { %v3724_v29 = vpop.eup %2256  ;;  %2270 = vpow2.f32 %v1576_v61  ;;  %1666 = vadd.xlane.f32.xlu1 %v1665_v1 }
 0x2a3   : > { %v3726_v44 = vpop.eup %2258  ;;  %v1578_v37 = vmul.f32 1.442695, %v1462_v32  ;;  %v1580_v45 = vmul.f32 1.442695, %v1463_v35 }
 0x2a4   : > { %v1397_v33 = vpop.xlane.xlu1 %1396  ;;  %v1668_v6 = vadd.f32 %v3726_v44, %v3724_v29 }
 0x2a5   : > { %2272 = vpow2.f32 %v1578_v37  ;;  %v1464_v56 = vsub.f32 %v3484_v15, %v1397_v33  ;;  %v1465_v55 = vsub.f32 %v3487_v46, %v1397_v33 }
 0x2a6   : > { %v3732_v10 = vpop.eup %2260  ;;  %2274 = vpow2.f32 %v1580_v45  ;;  %1669 = vadd.xlane.f32.xlu0 %v1668_v6 }
 0x2a7   : > { %v3734_v30 = vpop.eup %2262  ;;  %v1582_v61 = vmul.f32 1.442695, %v1464_v56  ;;  %v1584_v4 = vmul.f32 1.442695, %v1465_v55 }
 0x2a8   : > { %v1400_v1 = vpop.xlane.xlu0 %1399  ;;  %v1671_v32 = vadd.f32 %v3734_v30, %v3732_v10 }
 0x2a9   : > { %2276 = vpow2.f32 %v1582_v61  ;;  %v1466_v35 = vsub.f32 %v3498_v43, %v1400_v1  ;;  %v1467_v37 = vsub.f32 %v3501_v28, %v1400_v1 }
 0x2aa   : > { %v3740_v15 = vpop.eup %2264  ;;  %2278 = vpow2.f32 %v1584_v4  ;;  %1672 = vadd.xlane.f32.xlu1 %v1671_v32 }
 0x2ab   : > { %v3742_v46 = vpop.eup %2266  ;;  %v1586_v45 = vmul.f32 1.442695, %v1466_v35  ;;  %v1588_v33 = vmul.f32 1.442695, %v1467_v37 }
 0x2ac   : > { %v1403_v6 = vpop.xlane.xlu1 %1402  ;;  %v1674_v56 = vadd.f32 %v3742_v46, %v3740_v15 }
 0x2ad   : > { %2280 = vpow2.f32 %v1586_v45  ;;  %v1468_v55 = vsub.f32 %v3510_v22, %v1403_v6  ;;  %v1469_v61 = vsub.f32 %v3513_v5, %v1403_v6 }
 0x2ae   : > { %v3748_v43 = vpop.eup %2268  ;;  %2282 = vpow2.f32 %v1588_v33  ;;  %1675 = vadd.xlane.f32.xlu0 %v1674_v56 }
 0x2af   : > { %v3750_v28 = vpop.eup %2270  ;;  %v1590_v4 = vmul.f32 1.442695, %v1468_v55  ;;  %v1592_v1 = vmul.f32 1.442695, %v1469_v61 }
 0x2b0   : > { %4298 = vst [vmem:[#allocation27_spill] sm:$0xff] %v3750_v28  ;;  %v1406_v32 = vpop.xlane.xlu0 %1405  ;;  %v1677_v35 = vadd.f32 %v3750_v28, %v3748_v43 }
 0x2b1   : > { %2284 = vpow2.f32 %v1590_v4  ;;  %v1470_v37 = vsub.f32 %v3521_v48, %v1406_v32  ;;  %v1471_v45 = vsub.f32 %v3524_v23, %v1406_v32  ;;  %v4299_v4 = vld [vmem:[#allocation46_spill] sm:$0xff] }
 0x2b2   : > { %v3756_v22 = vpop.eup %2272  ;;  %2286 = vpow2.f32 %v1592_v1  ;;  %1678 = vadd.xlane.f32.xlu1 %v1677_v35 }
 0x2b3   : > { %v3758_v5 = vpop.eup %2274  ;;  %v1594_v33 = vmul.f32 1.442695, %v1470_v37  ;;  %v1596_v6 = vmul.f32 1.442695, %v1471_v45 }
 0x2b4   : > { %v1409_v56 = vpop.xlane.xlu1 %1408  ;;  %v1680_v55 = vadd.f32 %v3758_v5, %v3756_v22 }
 0x2b5   : > { %2288 = vpow2.f32 %v1594_v33  ;;  %v1472_v61 = vsub.f32 %v3531_v31, %v1409_v56  ;;  %v1473_v28 = vsub.f32 %v4299_v4, %v1409_v56 }
 0x2b6   : > { %v3764_v48 = vpop.eup %2276  ;;  %2290 = vpow2.f32 %v1596_v6  ;;  %1681 = vadd.xlane.f32.xlu0 %v1680_v55 }
 0x2b7   : > { %v3766_v23 = vpop.eup %2278  ;;  %v1598_v1 = vmul.f32 1.442695, %v1472_v61  ;;  %v1600_v32 = vmul.f32 1.442695, %v1473_v28 }
 0x2b8   : > { %v1683_v35 = vadd.f32 %v3766_v23, %v3764_v48 }
 0x2b9   : > { %2292 = vpow2.f32 %v1598_v1 }
 0x2ba   : > { %v3770_v37 = vpop.eup %2280  ;;  %2294 = vpow2.f32 %v1600_v32  ;;  %1684 = vadd.xlane.f32.xlu1 %v1683_v35 }
 0x2bb   : > { %v3772_v45 = vpop.eup %2282 }
 0x2bc   : > { %4300 = vst [vmem:[#allocation28_spill] sm:$0xff] %v3772_v45  ;;  %v1686_v31 = vadd.f32 %v3772_v45, %v3770_v37 }
 0x2be   : > { %v3776_v33 = vpop.eup %2284  ;;  %1687 = vadd.xlane.f32.xlu0 %v1686_v31 }
 0x2bf   : > { %4301 = vst [vmem:[#allocation30_spill] sm:$0xff] %v3776_v33  ;;  %v3778_v6 = vpop.eup %2286 }
 0x2c0   : > { %4302 = vst [vmem:[#allocation31_spill] sm:$0xff] %v3778_v6  ;;  %v1689_v28 = vadd.f32 %v3778_v6, %v3776_v33 }
 0x2c2   : > { %v3782_v56 = vpop.eup %2288  ;;  %1690 = vadd.xlane.f32.xlu1 %v1689_v28  ;;  %v4307_v28 = vlaneseq }
 0x2c3   : > { %4303 = vst [vmem:[#allocation33_spill] sm:$0xff] %v3782_v56  ;;  %v3784_v55 = vpop.eup %2290 }
 0x2c4   : > { %4304 = vst [vmem:[#allocation34_spill] sm:$0xff] %v3784_v55  ;;  %v1692_v61 = vadd.f32 %v3784_v55, %v3782_v56  ;;  %v1795_v6 = vand.u32 127, %v4307_v28  ;;  %v4309_v56 = vld [vmem:[#allocation3_spill] sm:$0xff] }
 0x2c6   : > { %v3788_v4 = vpop.eup %2292  ;;  %1693 = vadd.xlane.f32.xlu0 %v1692_v61  ;;  %v3795_v45 = vadd.s32 128, %v1795_v6 }
 0x2c7   : > { %4305 = vst [vmem:[#allocation36_spill] sm:$0xff] %v3788_v4  ;;  %v3790_v1 = vpop.eup %2294 }
 0x2c8   : > { %4306 = vst [vmem:[#allocation39_spill] sm:$0xff] %v3790_v1  ;;  %v1695_v32 = vadd.f32 %v3790_v1, %v3788_v4  ;;  %vm1798_vm13 = vcmp.eq.s32.totalorder %v3795_v45, 250 }
 0x2ca   : > { %1696 = vadd.xlane.f32.xlu1 %v1695_v32 }
 0x2e7   : > { %v1604_v35 = vpop.xlane.xlu0 %1603 }
 0x2e8   : > { %2296 = vrcp.f32 %v1604_v35  ;;  %v4308_v35 = vld [vmem:[#allocation2_spill] sm:$0xff] }
 0x2eb   : > { %v1607_v31 = vpop.xlane.xlu1 %1606 }
 0x2ec   : > { %2298 = vrcp.f32 %v1607_v31 }
 0x2ef   : > { %v1610_v33 = vpop.xlane.xlu0 %1609 }
 0x2f0   : > { %2300 = vrcp.f32 %v1610_v33 }
 0x2f3   : > { %v1613_v55 = vpop.xlane.xlu1 %1612 }
 0x2f4   : > { %2302 = vrcp.f32 %v1613_v55 }
 0x2f5   : > { %v2297_v61 = vpop.eup %2296 }
 0x2f6   : > { %v1730_v32 = vmul.f32 %v2297_v61, %v3548_v38  ;;  %v1731_v33 = vmul.f32 %v2297_v61, %v3550_v60 }
 0x2f7   : > { %v1616_v6 = vpop.xlane.xlu0 %1615 }
 0x2f8   : > { %v1800_v55 = vsel %vm1798_vm13, %v4308_v35, %v1731_v33  ;;  %1863 = vst [vmem:[%s3801_s24] sm:$0xff] %v1730_v32  ;;  %2304 = vrcp.f32 %v1616_v6 }
 0x2f9   : > { %v2299_v31 = vpop.eup %2298  ;;  %1864 = vst [vmem:[%s3801_s24 + $0x8] sm:$0xff] %v1800_v55 }
 0x2fa   : > { %v1732_v28 = vmul.f32 %v2299_v31, %v3557_v62  ;;  %v1733_v1 = vmul.f32 %v2299_v31, %v3560_v19  ;;  %v4310_v19 = vld [vmem:[#allocation4_spill] sm:$0xff] }
 0x2fb   : > { %v1619_v4 = vpop.xlane.xlu1 %1618 }
 0x2fc   : > { %v1802_v38 = vsel %vm1798_vm13, %v4309_v56, %v1733_v1  ;;  %1865 = vst [vmem:[%s3801_s24 + $0x10] sm:$0xff] %v1732_v28  ;;  %2306 = vrcp.f32 %v1619_v4 }
 0x2fd   : > { %v2301_v60 = vpop.eup %2300  ;;  %1866 = vst [vmem:[%s3801_s24 + $0x18] sm:$0xff] %v1802_v38  ;;  %v1628_v61 = vpop.xlane.xlu0 %1627 }
 0x2fe   : > { %v1734_v32 = vmul.f32 %v2301_v60, %v3567_v12  ;;  %v1735_v33 = vmul.f32 %v2301_v60, %v3570_v18  ;;  %2308 = vrcp.f32 %v1628_v61  ;;  %v4311_v18 = vld [vmem:[#allocation5_spill] sm:$0xff] }
 0x2ff   : > { %v1631_v62 = vpop.xlane.xlu1 %1630 }
 0x300   : > { %v1804_v6 = vsel %vm1798_vm13, %v4310_v19, %v1735_v33  ;;  %1867 = vst [vmem:[%s3801_s24 + $0x20] sm:$0xff] %v1734_v32  ;;  %2310 = vrcp.f32 %v1631_v62 }
 0x301   : > { %v2303_v56 = vpop.eup %2302  ;;  %1868 = vst [vmem:[%s3801_s24 + $0x28] sm:$0xff] %v1804_v6  ;;  %v1622_v4 = vpop.xlane.xlu0 %1621  ;;  %v4313_v6 = vld [vmem:[#allocation8_spill] sm:$0xff] }
 0x302   : > { %v1736_v1 = vmul.f32 %v2303_v56, %v3577_v2  ;;  %v1737_v35 = vmul.f32 %v2303_v56, %v3580_v58  ;;  %2312 = vrcp.f32 %v1622_v4  ;;  %v4312_v58 = vld [vmem:[#allocation6_spill] sm:$0xff] }
 0x303   : > { %v1625_v12 = vpop.xlane.xlu1 %1624 }
 0x304   : > { %v1806_v55 = vsel %vm1798_vm13, %v4311_v18, %v1737_v35  ;;  %1869 = vst [vmem:[%s3801_s24 + $0x30] sm:$0xff] %v1736_v1  ;;  %2314 = vrcp.f32 %v1625_v12 }
 0x305   : > { %v2305_v31 = vpop.eup %2304  ;;  %1870 = vst [vmem:[%s3801_s24 + $0x38] sm:$0xff] %v1806_v55  ;;  %v1634_v28 = vpop.xlane.xlu0 %1633 }
 0x306   : > { %v1738_v38 = vmul.f32 %v2305_v31, %v3587_v34  ;;  %v1739_v60 = vmul.f32 %v2305_v31, %v3590_v21  ;;  %2316 = vrcp.f32 %v1634_v28  ;;  %v4315_v31 = vld [vmem:[#allocation9_spill] sm:$0xff] }
 0x307   : > { %v1637_v2 = vpop.xlane.xlu1 %1636 }
 0x308   : > { %v1808_v61 = vsel %vm1798_vm13, %v4312_v58, %v1739_v60  ;;  %1871 = vst [vmem:[%s3801_s24 + $0x40] sm:$0xff] %v1738_v38  ;;  %2318 = vrcp.f32 %v1637_v2 }
 0x309   : > { %v2307_v32 = vpop.eup %2306  ;;  %1872 = vst [vmem:[%s3801_s24 + $0x48] sm:$0xff] %v1808_v61  ;;  %v1640_v33 = vpop.xlane.xlu0 %1639 }
 0x30a   : > { %v1740_v62 = vmul.f32 %v2307_v32, %v3596_v42  ;;  %v1741_v34 = vmul.f32 %v2307_v32, %v3598_v17  ;;  %2320 = vrcp.f32 %v1640_v33  ;;  %v4314_v42 = vld [vmem:[#allocation7_spill] sm:$0xff]  ;;  %v4317_v32 = vld [vmem:[#allocation12_spill] sm:$0xff] }
 0x30b   : > { %v2309_v21 = vpop.eup %2308  ;;  %v1643_v19 = vpop.xlane.xlu1 %1642 }
 0x30c   : > { %v1810_v56 = vsel %vm1798_vm13, %v4313_v6, %v1741_v34  ;;  %1873 = vst [vmem:[%s3801_s24 + $0x50] sm:$0xff] %v1740_v62  ;;  %v1746_v4 = vmul.f32 %v2309_v21, %v3600_v16  ;;  %v1747_v1 = vmul.f32 %v2309_v21, %v3604_v52  ;;  %2322 = vrcp.f32 %v1643_v19 }
 0x30d   : > { %v2311_v35 = vpop.eup %2310  ;;  %1874 = vst [vmem:[%s3801_s24 + $0x58] sm:$0xff] %v1810_v56 }
 0x30e   : > { %v1816_v17 = vsel %vm1798_vm13, %v4314_v42, %v1747_v1  ;;  %1879 = vst [vmem:[%s3801_s24 + $0x80] sm:$0xff] %v1746_v4  ;;  %v1748_v12 = vmul.f32 %v2311_v35, %v3608_v26  ;;  %v1749_v18 = vmul.f32 %v2311_v35, %v3612_v36  ;;  %v4316_v26 = vld [vmem:[#allocation10_spill] sm:$0xff] }
 0x30f   : > { %v2313_v55 = vpop.eup %2312  ;;  %1880 = vst [vmem:[%s3801_s24 + $0x88] sm:$0xff] %v1816_v17  ;;  %v1646_v16 = vpop.xlane.xlu0 %1645 }
 0x310   : > { %v1818_v52 = vsel %vm1798_vm13, %v4315_v31, %v1749_v18  ;;  %1881 = vst [vmem:[%s3801_s24 + $0x90] sm:$0xff] %v1748_v12  ;;  %v1742_v28 = vmul.f32 %v2313_v55, %v3614_v24  ;;  %v1743_v38 = vmul.f32 %v2313_v55, %v3618_v47  ;;  %2324 = vrcp.f32 %v1646_v16  ;;  %v4321_v18 = vld [vmem:[#allocation15_spill] sm:$0xff]  ;;  %v4322_v31 = vld [vmem:[#allocation16_spill] sm:$0xff] }
 0x311   : > { %v2315_v60 = vpop.eup %2314  ;;  %1882 = vst [vmem:[%s3801_s24 + $0x98] sm:$0xff] %v1818_v52 }
 0x312   : > { %v1812_v36 = vsel %vm1798_vm13, %v4316_v26, %v1743_v38  ;;  %1875 = vst [vmem:[%s3801_s24 + $0x60] sm:$0xff] %v1742_v28  ;;  %v1744_v2 = vmul.f32 %v2315_v60, %v3622_v49  ;;  %v1745_v58 = vmul.f32 %v2315_v60, %v3626_v50  ;;  %v4318_v49 = vld [vmem:[#allocation11_spill] sm:$0xff]  ;;  %v4323_v26 = vld [vmem:[#allocation17_spill] sm:$0xff] }
 0x313   : > { %v2317_v61 = vpop.eup %2316  ;;  %1876 = vst [vmem:[%s3801_s24 + $0x68] sm:$0xff] %v1812_v36  ;;  %v1649_v24 = vpop.xlane.xlu1 %1648  ;;  %v4324_v36 = vld [vmem:[#allocation20_spill] sm:$0xff] }
 0x314   : > { %v1814_v47 = vsel %vm1798_vm13, %v4317_v32, %v1745_v58  ;;  %1877 = vst [vmem:[%s3801_s24 + $0x70] sm:$0xff] %v1744_v2  ;;  %v1750_v33 = vmul.f32 %v2317_v61, %v3628_v51  ;;  %v1751_v62 = vmul.f32 %v2317_v61, %v3632_v59  ;;  %2326 = vrcp.f32 %v1649_v24  ;;  %v4319_v59 = vld [vmem:[#allocation13_spill] sm:$0xff]  ;;  %v4326_v32 = vld [vmem:[#allocation18_spill] sm:$0xff] }
 0x315   : > { %v2319_v34 = vpop.eup %2318  ;;  %1878 = vst [vmem:[%s3801_s24 + $0x78] sm:$0xff] %v1814_v47  ;;  %v4325_v58 = vld [vmem:[#allocation21_spill] sm:$0xff] }
 0x316   : > { %v1820_v50 = vsel %vm1798_vm13, %v4318_v49, %v1751_v62  ;;  %1883 = vst [vmem:[%s3801_s24 + $0xa0] sm:$0xff] %v1750_v33  ;;  %v1752_v21 = vmul.f32 %v2319_v34, %v3636_v41  ;;  %v1753_v19 = vmul.f32 %v2319_v34, %v3640_v63  ;;  %v4320_v41 = vld [vmem:[#allocation14_spill] sm:$0xff]  ;;  %v4327_v33 = vld [vmem:[#allocation23_spill] sm:$0xff] }
 0x317   : > { %v2321_v6 = vpop.eup %2320  ;;  %1884 = vst [vmem:[%s3801_s24 + $0xa8] sm:$0xff] %v1820_v50  ;;  %v1652_v51 = vpop.xlane.xlu0 %1651  ;;  %v4328_v49 = vld [vmem:[#allocation19_spill] sm:$0xff] }
 0x318   : > { %v1822_v56 = vsel %vm1798_vm13, %v4319_v59, %v1753_v19  ;;  %1885 = vst [vmem:[%s3801_s24 + $0xb0] sm:$0xff] %v1752_v21  ;;  %v1754_v4 = vmul.f32 %v2321_v6, %v3642_v57  ;;  %v1755_v1 = vmul.f32 %v2321_v6, %v3646_v8  ;;  %2328 = vrcp.f32 %v1652_v51  ;;  %v4329_v59 = vld [vmem:[#allocation22_spill] sm:$0xff] }
 0x319   : > { %v2323_v35 = vpop.eup %2322  ;;  %1886 = vst [vmem:[%s3801_s24 + $0xb8] sm:$0xff] %v1822_v56 }
 0x31a   : > { %v1824_v63 = vsel %vm1798_vm13, %v4320_v41, %v1755_v1  ;;  %1887 = vst [vmem:[%s3801_s24 + $0xc0] sm:$0xff] %v1754_v4  ;;  %v1756_v42 = vmul.f32 %v2323_v35, %v3650_v14  ;;  %v1757_v17 = vmul.f32 %v2323_v35, %v3654_v39  ;;  %v4330_v1 = vld [vmem:[#allocation24_spill] sm:$0xff] }
 0x31b   : > { %1888 = vst [vmem:[%s3801_s24 + $0xc8] sm:$0xff] %v1824_v63  ;;  %v1655_v12 = vpop.xlane.xlu1 %1654  ;;  %v4331_v63 = vld [vmem:[#allocation25_spill] sm:$0xff] }
 0x31c   : > { %v1826_v57 = vsel %vm1798_vm13, %v4321_v18, %v1757_v17  ;;  %1889 = vst [vmem:[%s3801_s24 + $0xd0] sm:$0xff] %v1756_v42  ;;  %2330 = vrcp.f32 %v1655_v12  ;;  %v4332_v18 = vld [vmem:[#allocation26_spill] sm:$0xff] }
 0x31d   : > { %v2325_v8 = vpop.eup %2324  ;;  %1890 = vst [vmem:[%s3801_s24 + $0xd8] sm:$0xff] %v1826_v57 }
 0x31e   : > { %v1758_v55 = vmul.f32 %v2325_v8, %v3660_v40  ;;  %v1759_v16 = vmul.f32 %v2325_v8, %v3662_v27 }
 0x31f   : > { %v1658_v14 = vpop.xlane.xlu0 %1657 }
 0x320   : > { %v1828_v39 = vsel %vm1798_vm13, %v4322_v31, %v1759_v16  ;;  %1891 = vst [vmem:[%s3801_s24 + $0xe0] sm:$0xff] %v1758_v55  ;;  %2332 = vrcp.f32 %v1658_v14  ;;  %v4333_v14 = vld [vmem:[#allocation29_spill] sm:$0xff] }
 0x321   : > { %v2327_v52 = vpop.eup %2326  ;;  %1892 = vst [vmem:[%s3801_s24 + $0xe8] sm:$0xff] %v1828_v39 }
 0x322   : > { %v1760_v28 = vmul.f32 %v2327_v52, %v3668_v11  ;;  %v1761_v38 = vmul.f32 %v2327_v52, %v3670_v13 }
 0x323   : > { %v1661_v60 = vpop.xlane.xlu1 %1660 }
 0x324   : > { %v1830_v40 = vsel %vm1798_vm13, %v4323_v26, %v1761_v38  ;;  %1893 = vst [vmem:[%s3801_s24 + $0xf0] sm:$0xff] %v1760_v28  ;;  %2334 = vrcp.f32 %v1661_v60  ;;  %v4334_v28 = vld [vmem:[#allocation32_spill] sm:$0xff] }
 0x325   : > { %v2329_v27 = vpop.eup %2328  ;;  %1894 = vst [vmem:[%s3801_s24 + $0xf8] sm:$0xff] %v1830_v40  ;;  %v4335_v40 = vld [vmem:[#allocation35_spill] sm:$0xff] }
 0x326   : > { %v1762_v2 = vmul.f32 %v2329_v27, %v4324_v36  ;;  %v1763_v61 = vmul.f32 %v2329_v27, %v4325_v58  ;;  %v4336_v58 = vld [vmem:[#allocation37_spill] sm:$0xff] }
 0x327   : > { %v1664_v24 = vpop.xlane.xlu0 %1663 }
 0x328   : > { %v1832_v11 = vsel %vm1798_vm13, %v4326_v32, %v1763_v61  ;;  %1895 = vst [vmem:[%s3801_s24 + $0x100] sm:$0xff] %v1762_v2  ;;  %2336 = vrcp.f32 %v1664_v24  ;;  %v4337_v24 = vld [vmem:[#allocation27_spill] sm:$0xff] }
 0x329   : > { %v2331_v13 = vpop.eup %2330  ;;  %1896 = vst [vmem:[%s3801_s24 + $0x108] sm:$0xff] %v1832_v11 }
 0x32a   : > { %v1764_v47 = vmul.f32 %v2331_v13, %v3684_v54  ;;  %v1765_v62 = vmul.f32 %v2331_v13, %v4327_v33  ;;  %v4338_v13 = vld [vmem:[#allocation38_spill] sm:$0xff] }
 0x32b   : > { %v1667_v34 = vpop.xlane.xlu1 %1666 }
 0x32c   : > { %v1834_v50 = vsel %vm1798_vm13, %v4328_v49, %v1765_v62  ;;  %1897 = vst [vmem:[%s3801_s24 + $0x110] sm:$0xff] %v1764_v47  ;;  %2338 = vrcp.f32 %v1667_v34  ;;  %v4339_v34 = vld [vmem:[#allocation40_spill] sm:$0xff] }
 0x32d   : > { %v2333_v21 = vpop.eup %2332  ;;  %1898 = vst [vmem:[%s3801_s24 + $0x118] sm:$0xff] %v1834_v50 }
 0x32e   : > { %v1766_v19 = vmul.f32 %v2333_v21, %v3692_v9  ;;  %v1767_v6 = vmul.f32 %v2333_v21, %v3694_v25 }
 0x32f   : > { %v1670_v51 = vpop.xlane.xlu0 %1669 }
 0x330   : > { %v1836_v54 = vsel %vm1798_vm13, %v4329_v59, %v1767_v6  ;;  %1899 = vst [vmem:[%s3801_s24 + $0x120] sm:$0xff] %v1766_v19  ;;  %2340 = vrcp.f32 %v1670_v51  ;;  %v4341_v59 = vld [vmem:[#allocation28_spill] sm:$0xff] }
 0x331   : > { %v2335_v56 = vpop.eup %2334  ;;  %1900 = vst [vmem:[%s3801_s24 + $0x128] sm:$0xff] %v1836_v54 }
 0x332   : > { %v1768_v4 = vmul.f32 %v2335_v56, %v3700_v20  ;;  %v1769_v35 = vmul.f32 %v2335_v56, %v4330_v1  ;;  %v4342_v56 = vld [vmem:[#allocation42_spill] sm:$0xff] }
 0x333   : > { %v1673_v41 = vpop.xlane.xlu1 %1672 }
 0x334   : > { %v1838_v9 = vsel %vm1798_vm13, %v4331_v63, %v1769_v35  ;;  %1901 = vst [vmem:[%s3801_s24 + $0x130] sm:$0xff] %v1768_v4  ;;  %2342 = vrcp.f32 %v1673_v41  ;;  %v4343_v4 = vld [vmem:[#allocation30_spill] sm:$0xff]  ;;  %v4344_v35 = vld [vmem:[#allocation31_spill] sm:$0xff] }
 0x335   : > { %v2337_v25 = vpop.eup %2336  ;;  %1902 = vst [vmem:[%s3801_s24 + $0x138] sm:$0xff] %v1838_v9  ;;  %v4345_v63 = vld [vmem:[#allocation43_spill] sm:$0xff] }
 0x336   : > { %v1770_v42 = vmul.f32 %v2337_v25, %v3708_v3  ;;  %v1771_v17 = vmul.f32 %v2337_v25, %v3710_v53  ;;  %v4346_v25 = vld [vmem:[#allocation33_spill] sm:$0xff] }
 0x337   : > { %v1676_v12 = vpop.xlane.xlu0 %1675 }
 0x338   : > { %v1840_v20 = vsel %vm1798_vm13, %v4332_v18, %v1771_v17  ;;  %1903 = vst [vmem:[%s3801_s24 + $0x140] sm:$0xff] %v1770_v42  ;;  %2344 = vrcp.f32 %v1676_v12  ;;  %v4347_v17 = vld [vmem:[#allocation34_spill] sm:$0xff]  ;;  %v4348_v18 = vld [vmem:[#allocation44_spill] sm:$0xff] }
 0x339   : > { %v2339_v57 = vpop.eup %2338  ;;  %1904 = vst [vmem:[%s3801_s24 + $0x148] sm:$0xff] %v1840_v20 }
 0x33a   : > { %v1772_v8 = vmul.f32 %v2339_v57, %v3716_v7  ;;  %v1773_v55 = vmul.f32 %v2339_v57, %v3718_v0 }
 0x33b   : > { %v1679_v16 = vpop.xlane.xlu1 %1678 }
 0x33c   : > { %v1842_v3 = vsel %vm1798_vm13, %v4333_v14, %v1773_v55  ;;  %1905 = vst [vmem:[%s3801_s24 + $0x150] sm:$0xff] %v1772_v8  ;;  %2346 = vrcp.f32 %v1679_v16  ;;  %v4349_v8 = vld [vmem:[#allocation36_spill] sm:$0xff]  ;;  %v4350_v16 = vld [vmem:[#allocation39_spill] sm:$0xff] }
 0x33d   : > { %v2341_v53 = vpop.eup %2340  ;;  %1906 = vst [vmem:[%s3801_s24 + $0x158] sm:$0xff] %v1842_v3  ;;  %v4351_v3 = vld [vmem:[#allocation45_spill] sm:$0xff] }
 0x33e   : > { %v1774_v31 = vmul.f32 %v2341_v53, %v3724_v29  ;;  %v1775_v39 = vmul.f32 %v2341_v53, %v3726_v44 }
 0x33f   : > { %v1682_v52 = vpop.xlane.xlu0 %1681 }
 0x340   : > { %v1844_v7 = vsel %vm1798_vm13, %v4334_v28, %v1775_v39  ;;  %1907 = vst [vmem:[%s3801_s24 + $0x160] sm:$0xff] %v1774_v31  ;;  %2348 = vrcp.f32 %v1682_v52 }
 0x341   : > { %v2343_v0 = vpop.eup %2342  ;;  %1908 = vst [vmem:[%s3801_s24 + $0x168] sm:$0xff] %v1844_v7 }
 0x342   : > { %v1776_v38 = vmul.f32 %v2343_v0, %v3732_v10  ;;  %v1777_v60 = vmul.f32 %v2343_v0, %v3734_v30 }
 0x343   : > { %v1685_v26 = vpop.xlane.xlu1 %1684 }
 0x344   : > { %v1846_v29 = vsel %vm1798_vm13, %v4335_v40, %v1777_v60  ;;  %1909 = vst [vmem:[%s3801_s24 + $0x170] sm:$0xff] %v1776_v38  ;;  %2350 = vrcp.f32 %v1685_v26 }
 0x345   : > { %v2345_v44 = vpop.eup %2344  ;;  %1910 = vst [vmem:[%s3801_s24 + $0x178] sm:$0xff] %v1846_v29 }
 0x346   : > { %v1778_v27 = vmul.f32 %v2345_v44, %v3740_v15  ;;  %v1779_v36 = vmul.f32 %v2345_v44, %v3742_v46 }
 0x347   : > { %v1688_v2 = vpop.xlane.xlu0 %1687 }
 0x348   : > { %v1848_v10 = vsel %vm1798_vm13, %v4336_v58, %v1779_v36  ;;  %1911 = vst [vmem:[%s3801_s24 + $0x180] sm:$0xff] %v1778_v27  ;;  %2352 = vrcp.f32 %v1688_v2 }
 0x349   : > { %v2347_v30 = vpop.eup %2346  ;;  %1912 = vst [vmem:[%s3801_s24 + $0x188] sm:$0xff] %v1848_v10 }
 0x34a   : > { %v1780_v61 = vmul.f32 %v2347_v30, %v3748_v43  ;;  %v1781_v32 = vmul.f32 %v2347_v30, %v4337_v24 }
 0x34b   : > { %v1691_v11 = vpop.xlane.xlu1 %1690 }
 0x34c   : > { %v1850_v15 = vsel %vm1798_vm13, %v4338_v13, %v1781_v32  ;;  %1913 = vst [vmem:[%s3801_s24 + $0x190] sm:$0xff] %v1780_v61  ;;  %2354 = vrcp.f32 %v1691_v11 }
 0x34d   : > { %v2349_v46 = vpop.eup %2348  ;;  %1914 = vst [vmem:[%s3801_s24 + $0x198] sm:$0xff] %v1850_v15 }
 0x34e   : > { %v1782_v47 = vmul.f32 %v2349_v46, %v3756_v22  ;;  %v1783_v33 = vmul.f32 %v2349_v46, %v3758_v5  ;;  %v4340_v22 = vld [vmem:[#allocation41_spill] sm:$0xff] }
 0x34f   : > { %v1694_v62 = vpop.xlane.xlu0 %1693 }
 0x350   : > { %v1852_v43 = vsel %vm1798_vm13, %v4339_v34, %v1783_v33  ;;  %1915 = vst [vmem:[%s3801_s24 + $0x1a0] sm:$0xff] %v1782_v47  ;;  %2356 = vrcp.f32 %v1694_v62 }
 0x351   : > { %v2351_v49 = vpop.eup %2350  ;;  %1916 = vst [vmem:[%s3801_s24 + $0x1a8] sm:$0xff] %v1852_v43 }
 0x352   : > { %v1784_v50 = vmul.f32 %v2351_v49, %v3764_v48  ;;  %v1785_v21 = vmul.f32 %v2351_v49, %v3766_v23 }
 0x353   : > { %v1697_v19 = vpop.xlane.xlu1 %1696 }
 0x354   : > { %v1854_v5 = vsel %vm1798_vm13, %v4340_v22, %v1785_v21  ;;  %1917 = vst [vmem:[%s3801_s24 + $0x1b0] sm:$0xff] %v1784_v50  ;;  %2358 = vrcp.f32 %v1697_v19 }
 0x355   : > { %v2353_v6 = vpop.eup %2352  ;;  %1918 = vst [vmem:[%s3801_s24 + $0x1b8] sm:$0xff] %v1854_v5 }
 0x356   : > { %v1786_v51 = vmul.f32 %v2353_v6, %v3770_v37  ;;  %v1787_v54 = vmul.f32 %v2353_v6, %v4341_v59 }
 0x358   : > { %v1856_v48 = vsel %vm1798_vm13, %v4342_v56, %v1787_v54  ;;  %1919 = vst [vmem:[%s3801_s24 + $0x1c0] sm:$0xff] %v1786_v51 }
 0x359   : > { %v2355_v23 = vpop.eup %2354  ;;  %1920 = vst [vmem:[%s3801_s24 + $0x1c8] sm:$0xff] %v1856_v48 }
 0x35a   : > { %v1788_v1 = vmul.f32 %v2355_v23, %v4343_v4  ;;  %v1789_v41 = vmul.f32 %v2355_v23, %v4344_v35 }
 0x35c   : > { %v1858_v37 = vsel %vm1798_vm13, %v4345_v63, %v1789_v41  ;;  %1921 = vst [vmem:[%s3801_s24 + $0x1d0] sm:$0xff] %v1788_v1 }
 0x35d   : > { %v2357_v9 = vpop.eup %2356  ;;  %1922 = vst [vmem:[%s3801_s24 + $0x1d8] sm:$0xff] %v1858_v37 }
 0x35e   : > { %v1790_v42 = vmul.f32 %v2357_v9, %v4346_v25  ;;  %v1791_v12 = vmul.f32 %v2357_v9, %v4347_v17 }
 0x360   : > { %v1860_v20 = vsel %vm1798_vm13, %v4348_v18, %v1791_v12  ;;  %1923 = vst [vmem:[%s3801_s24 + $0x1e0] sm:$0xff] %v1790_v42 }
 0x361   : > { %v2359_v57 = vpop.eup %2358  ;;  %1924 = vst [vmem:[%s3801_s24 + $0x1e8] sm:$0xff] %v1860_v20 }
 0x362   : > { %v1792_v55 = vmul.f32 %v2359_v57, %v4349_v8  ;;  %v1793_v14 = vmul.f32 %v2359_v57, %v4350_v16 }
 0x364   : > { %v1862_v53 = vsel %vm1798_vm13, %v4351_v3, %v1793_v14  ;;  %1925 = vst [vmem:[%s3801_s24 + $0x1f0] sm:$0xff] %v1792_v55 }
 0x365   : > { %1926 = vst [vmem:[%s3801_s24 + $0x1f8] sm:$0xff] %v1862_v53 }
 0x366 PF: > { %s16_s21 = sadd.s32 1, %s2366_s21  }
 0x367   : > { %p13_p5 = scmp.ge.s32.totalorder %s16_s21, 4  }
 0x369   :  { %15 = sbr.rel (!%p13_p5) target bundleno = 1 (0x1), region = 77 }

</bundles_post_ra>
